<compile_context>
chip_gen: v6e
topology: v6e:2x2x1
jax: 0.10.0
libtpu: 0.0.40
codegen_flags: <defaults>
</compile_context>

<pallas_src>
import jax
import jax.numpy as jnp
from jax.experimental import pallas as pl
from jax.experimental.pallas import tpu as pltpu

# Module defaults (synthetic, small shapes consistent with a poker net).
NUM_INPUTS = 32
NUM_ACTIONS = 8

# Group rows per grid step for the lane-dense path. One group row packs
# r = 128 // n_actions = 16 batch rows, so 2048 group rows = 32768 batch rows
# per step: x-tile bf16 = 2 MiB, out f32 = 1 MiB; double-buffered total
# ~6.5 MiB -> fits the scoped-VMEM default on v5e/v6e/v7x.
MAX_GROUP_TILE = 2048

# Below this batch size a pallas_call's launch/DMA-setup overhead dwarfs the
# matmul itself; use plain jnp and let XLA fuse it into the caller.
TINY_BATCH = 256


def _matmul_kernel(x_ref, w_ref, o_ref):
    # x_ref: (tm, K) bf16/f32, w_ref: (K, N) bf16/f32, o_ref: (tm, N) f32.
    o_ref[...] = jnp.dot(
        x_ref[...], w_ref[...], preferred_element_type=jnp.float32
    )


def _pick_row_tile(m):
    """Row-tile size: big tiles to amortize per-step overhead, but keep the
    grid >= 2 steps when legal so a v7x megacore shards across both TCs."""
    if m > MAX_GROUP_TILE:
        return MAX_GROUP_TILE
    # Whole batch fits in one block: split in two when both halves stay
    # multiples of 8 (sublane rule); otherwise take the full array as the block.
    if m >= 16 and m % 16 == 0:
        return m // 2
    return m


def _tiled_matmul(x, w):
    """y = x @ w with the row (batch) axis tiled over a parallel 1-D grid.

    x: (M, K), w: (K, N) -> (M, N) f32.  The weight BlockSpec returns the same
    block index every step, so it stays resident in VMEM (DMA'd once).
    """
    M, K = x.shape
    N = w.shape[1]
    tm = _pick_row_tile(M)
    grid = (pl.cdiv(M, tm),)

    cost = pl.CostEstimate(
        flops=2 * M * K * N,
        transcendentals=0,
        bytes_accessed=(
            x.size * x.dtype.itemsize        # x read
            + w.size * w.dtype.itemsize      # weight read (once)
            + M * N * 4                      # f32 output write
        ),
    )

    return pl.pallas_call(
        _matmul_kernel,
        out_shape=jax.ShapeDtypeStruct((M, N), jnp.float32),
        grid_spec=pl.GridSpec(
            grid=grid,
            in_specs=[
                pl.BlockSpec((tm, K), lambda i: (i, 0)),   # batch-tiled input
                pl.BlockSpec((K, N), lambda i: (0, 0)),    # weight, VMEM-resident
            ],
            out_specs=pl.BlockSpec((tm, N), lambda i: (i, 0)),
        ),
        compiler_params=pltpu.CompilerParams(
            dimension_semantics=("parallel",),  # batch rows are independent
        ),
        cost_estimate=cost,
    )(x, w)


def init_pokernet_params(w):
    """One-time weight prep (hoisted out of the per-call path).

    w: (n_actions, n_inputs) f32 -- PyTorch nn.Linear weight layout.
    Returns dict with:
      w_t            : (n_inputs, n_actions) f32   -- tiny-batch / generic path
      rows_per_group : int or None                 -- 128 // n_actions if it divides
      w_big          : (rows_per_group*n_inputs, 128) bf16 block-diagonal
                       kron(I_r, W.T) for the lane-dense packed path
    """
    w = jnp.asarray(w, jnp.float32)
    n_actions, _ = w.shape
    w_t = w.T  # (n_inputs, n_actions)
    params = {"w_t": w_t, "rows_per_group": None, "w_big": None}
    if 128 % n_actions == 0:
        r = 128 // n_actions
        params["rows_per_group"] = r
        # Block-diagonal weight: out[g, p*N + j] = sum_k x[g*r + p, k] * w_t[k, j]
        # Stored in bf16: the kernel is HBM-bound; accumulation stays f32.
        params["w_big"] = jnp.kron(jnp.eye(r, dtype=jnp.float32), w_t).astype(
            jnp.bfloat16
        )
    return params


def pokernet_forward(x, params):
    """Forward pass of PokerNet: y = x @ W.T (no bias).

    x: (B, n_inputs) f32; params from init_pokernet_params.
    returns: (B, n_actions) f32.
    """
    x = jnp.asarray(x, jnp.float32)
    B, n_inputs = x.shape
    w_t = params["w_t"]
    n_actions = w_t.shape[1]
    r = params["rows_per_group"]

    # Tiny batches (including the module's B=2 case): skip Pallas; a fused
    # XLA matmul is effectively free while a kernel launch costs microseconds.
    if B <= TINY_BATCH:
        return x @ w_t

    if r is not None:
        # Lane-dense path: zero-pad B to a multiple of r, fold r batch rows
        # into one 128-lane output row (free row-major reshape views), run the
        # bf16 (tile, r*K) @ (r*K, 128) matmul, and slice the result back.
        # (If the caller can produce bf16 activations directly, the cast below
        #  becomes a no-op and the wrapper-side traffic drops further.)
        pad = (-B) % r
        x_pad = jnp.pad(x, ((0, pad), (0, 0))) if pad else x
        G = x_pad.shape[0] // r
        x_packed = x_pad.reshape(G, r * n_inputs).astype(jnp.bfloat16)
        y_packed = _tiled_matmul(x_packed, params["w_big"])  # (G, 128) f32
        return y_packed.reshape(G * r, n_actions)[:B]

    # Generic fallback (only if 128 % n_actions != 0): exact f32 row-tiled
    # matmul with an n_actions-lane output (masked stores, rarely hit).
    return _tiled_matmul(x, w_t)


if __name__ == "__main__":
    key = jax.random.PRNGKey(0)
    kw, kx1, kx2, kx3 = jax.random.split(key, 4)

    # Deterministic init of fc1.weight, shape (n_actions, n_inputs),
    # matching nn.Linear's weight layout (uniform-ish init, synthetic).
    bound = 1.0 / (NUM_INPUTS ** 0.5)
    w = jax.random.uniform(
        kw, (NUM_ACTIONS, NUM_INPUTS), dtype=jnp.float32,
        minval=-bound, maxval=bound,
    )
    params = init_pokernet_params(w)

    # 1) Small shape from the module spec (B=2): tiny-batch bypass, exact f32.
    x_small = jax.random.normal(kx1, (2, NUM_INPUTS), dtype=jnp.float32)
    y_small = jax.block_until_ready(pokernet_forward(x_small, params))
    assert y_small.shape == (2, NUM_ACTIONS)
    assert jnp.allclose(y_small, x_small @ w.T, atol=1e-5, rtol=1e-5)

    # 2) Large batch, lane-dense bf16 Pallas path: B = 32768 -> G = 2048 group
    #    rows -> tile = 1024, grid = (2,) (one tile per v7x TensorCore).
    B_big = 16 * 2048
    x_big = jax.random.normal(kx2, (B_big, NUM_INPUTS), dtype=jnp.float32)
    y_big = jax.block_until_ready(pokernet_forward(x_big, params))
    assert y_big.shape == (B_big, NUM_ACTIONS)
    # bf16 inputs with f32 accumulation: ~1e-2-level agreement vs f32 reference.
    assert jnp.allclose(y_big, x_big @ w.T, atol=3e-2, rtol=3e-2)

    # 3) Large batch NOT divisible by 16: pad-into-lane-dense path.
    B_odd = 1000
    x_odd = jax.random.normal(kx3, (B_odd, NUM_INPUTS), dtype=jnp.float32)
    y_odd = jax.block_until_ready(pokernet_forward(x_odd, params))
    assert y_odd.shape == (B_odd, NUM_ACTIONS)
    assert jnp.allclose(y_odd, x_odd @ w.T, atol=3e-2, rtol=3e-2)

    print("KERNEL_OK")
</pallas_src>

<mosaic_0001>
module attributes {stable_mosaic.version = 11 : i64} {
  func.func @_matmul_kernel(%arg0: i32, %arg1: memref<1024x512xbf16, #tpu.memory_space<vmem>>, %arg2: memref<512x128xbf16, #tpu.memory_space<vmem>>, %arg3: memref<1024x128xf32, #tpu.memory_space<vmem>>) attributes {dimension_semantics = [#tpu.dimension_semantics<parallel>], iteration_bounds = array<i64: 2>, scalar_prefetch = 0 : i64, scratch_operands = 0 : i64, tpu.core_type = #tpu.core_type<tc>, window_params = [{transform_indices = @transform_0, window_bounds = array<i64: 1024, 512>}, {pipeline_mode = #tpu.pipeline_mode<synchronous>, transform_indices = @transform_1, window_bounds = array<i64: 512, 128>}, {transform_indices = @transform_2, window_bounds = array<i64: 1024, 128>}]} {
    %c0 = arith.constant 0 : index
    %c0_0 = arith.constant 0 : index
    %0 = vector.load %arg1[%c0, %c0_0] : memref<1024x512xbf16, #tpu.memory_space<vmem>>, vector<1024x512xbf16>
    %c0_1 = arith.constant 0 : index
    %c0_2 = arith.constant 0 : index
    %1 = vector.load %arg2[%c0_1, %c0_2] : memref<512x128xbf16, #tpu.memory_space<vmem>>, vector<512x128xbf16>
    %cst = arith.constant dense<0.000000e+00> : vector<1024x128xf32>
    %2 = tpu.matmul %0, %1, %cst {dimension_numbers = #tpu.dot_dimension_numbers<[1], [0], [0], [1], [0, 0, 1, 1], [], []>} : vector<1024x512xbf16>, vector<512x128xbf16>, vector<1024x128xf32> -> vector<1024x128xf32>
    %c0_3 = arith.constant 0 : index
    %c0_4 = arith.constant 0 : index
    %3 = vector.load %arg3[%c0_3, %c0_4] : memref<1024x128xf32, #tpu.memory_space<vmem>>, vector<1024x128xf32>
    tpu.vector_store %arg3[%c0_3, %c0_4], %2 {strides = array<i32>} : memref<1024x128xf32, #tpu.memory_space<vmem>>, vector<1024x128xf32>,
    return
  }
  func.func @transform_0(%arg0: i32) -> (i32, i32) {
    %c0_i32 = arith.constant 0 : i32
    %c0_i32_0 = arith.constant 0 : i32
    return %arg0, %c0_i32 : i32, i32
  }
  func.func @transform_1(%arg0: i32) -> (i32, i32) {
    %c0_i32 = arith.constant 0 : i32
    %c0_i32_0 = arith.constant 0 : i32
    %c0_i32_1 = arith.constant 0 : i32
    return %c0_i32, %c0_i32_0 : i32, i32
  }
  func.func @transform_2(%arg0: i32) -> (i32, i32) {
    %c0_i32 = arith.constant 0 : i32
    %c0_i32_0 = arith.constant 0 : i32
    return %arg0, %c0_i32 : i32, i32
  }
}

</mosaic_0001>

<bundles_post_ra>
// kernel: tpu_custom_call.1
= control target key start
LH: loop header
LB: loop body
LE: loop exit
PB: predicated region body
PF: predicated region fallthrough
CT: control target
= control target key end

     0   :  { %7 = vsyncpa [#allocation3], 0  ;;  %s4824_s0 = inlined_call_operand.hbm [shape: bf16[2048,512], index: 0, kind: input, shape index: {}]   ;;  %s4825_s1 = inlined_call_operand.hbm [shape: bf16[512,128], index: 1, kind: input, shape index: {}]   ;;  %s4826_s2 = inlined_call_operand.hbm [shape: f32[2048,128], index: 2, kind: output, shape index: {}]  }
   0x1   :  { %9 = vsyncpa [#allocation3 + $0x1], 0 }
   0x2   :  { %10 = vsyncpa [#allocation6], 0 }
   0x3   :  { %11 = vsyncpa [#allocation4], 0 }
   0x4   :  { %13 = vsyncpa [#allocation4 + $0x1], 0  ;;  %s4225_s9 = smov 0   ;;  %s4227_s10 = smov 0  }
   0x5   :  { %s4229_s11 = smov 0   ;;  %s4231_s12 = smov 0  }
   0x6 LB: > { %s4246_s13 = sadd.s32 4294967295, %s4198_s12   ;;  %s3288_s14 = sadd.s32 4294967294, %s4198_s12   ;;  %s4198_s12 = sphi %s4231_s12, %s4848_s12   ;;  %s4194_s11 = sphi %s4229_s11, %s4847_s11   ;;  %s4190_s10 = sphi %s4227_s10, %s4846_s10   ;;  %s4186_s9 = sphi %s4225_s9, %s4845_s9  }
   0x7   : > { %p39_p0 = scmp.ne.s32.totalorder %s4190_s10, %s4186_s9  ;;  %p4827_p1 = scmp.eq.s32.totalorder %s4246_s13, 0 }
   0x8   : > { %p90_p3 = scmp.eq.s32.totalorder %s3288_s14, 1  ;;  %p3289_p5 = scmp.ge.s32.totalorder %s4198_s12, 1 }
   0x9   : > { %p4255_p4 = por %p4827_p1, %p39_p0  ;;  %p97_p7 = scmp.lt.s32.totalorder %s4198_s12, 3 }
   0xa   : > { %p4260_p6 = por %p90_p3, %p39_p0  ;;  %s4200_s18 = smov [#allocation5]  }
   0xb   : > { %s4831_s15 = scalar_select %p4255_p4, 1, 0 }
   0xc   : > { %s4832_s16 = scalar_select %p4260_p6, 1, 0 }
   0xd   : > { %p4265_p8 = pnand %p3289_p5, %p97_p7  ;;  %s109_s19 = sshll.u32 %s4200_s18, 4  ;;  %s110_s19 = int_to_ptr.vmem [resolvable:$true] %s109_s19 }
   0xe   : > { %s4279_s21 = sadd.s32 1, %s4198_s12   ;;  %s26_s22 = sadd.s32 1, %s4194_s11 }
   0xf   : > { %s4833_s17 = scalar_select %p4265_p8, 1, 0 }
  0x10   : > { %p3604_p9 = pneg %p4265_p8  ;;  %s23_s23 = ssub.s32 %s4198_s12, %s4279_s21 }
  0x11   : > { %s4087_s24 = scalar_lea.vmem %s110_s19, 4096  ;;  %p4095_p5 = scmp.lt.s32.totalorder %s110_s19, %s110_s19 }
  0x12   : > { %p4274_p11 = pnand %p3604_p9, %p4827_p1  ;;  %p4088_p13 = scmp.ne.s32.totalorder %s110_s19, %s4087_s24 }
  0x13   : > { %p4096_p7 = scmp.lt.s32.totalorder %s4087_s24, %s4087_s24 }
  0x14   : > { %p4078_p12 = pneg %p4274_p11 }
  0x15   : > { %p4097_p10 = por %p4096_p7, %p4095_p5 }
  0x16   : > { %p4090_p0 = pnand %p4088_p13, %p4078_p12 }
  0x18   : > { %p4091_p3 = pneg %p4090_p0 }
  0x1a   : > { %p4098_p2 = pnand %p4097_p10, %p4091_p3 }
  0x1c   : > { %4101 = shalt.err (!%p4098_p2)
}
  0x1d   : > { %s4201_s25 = smov 64   ;;  %s4202_s26 = smov 4  }
  0x1e   : > { %3607 = dma.hbm_to_vmem [thread:$0]  (!%p4274_p11), %s4825_s1, 4096, %s110_s19, [#allocation6], %s4201_s25, %s4201_s25, %s4202_s26  }
  0x1f   : > { %p24_p9 = scmp.eq.s32.totalorder %s23_s23, 0  ;;  %p33_p12 = scmp.ne.s32.totalorder %s4194_s11, %s4190_s10 }
  0x20   : > { %p34_p10 = scmp.eq.s32.totalorder %s4198_s12, 0  ;;  %p3617_p2 = scmp.lt.s32.totalorder %s4198_s12, 2 }
  0x21   : > { %s4296_s29 = scalar_select %p24_p9, %s4194_s11, %s26_s22  }
  0x22   : > { %p35_p13 = por %p34_p10, %p33_p12  ;;  %p4835_p0 = scmp.eq.s32.totalorder %s4246_s13, 1 }
  0x23   : > { %s123_s3 = sand.u32 1, %s4194_s11   ;;  %s3594_s4 = sshll.u32 %s4198_s12, 15 }
  0x24   : > { %p4300_p3 = por %p4835_p0, %p33_p12  ;;  %s3292_s5 = sshll.u32 %s123_s3, 11 }
  0x25   : > { %s4309_s8 = scalar_lea.hbm %s4824_s0, %s3594_s4  ;;  %s127_s14 = scalar_lea.vmem [#allocation2], %s3292_s5 }
  0x26   : > { %s4836_s30 = scalar_select %p4300_p3, 1, 0 }
  0x27   : > { %s135_s18 = sshll.u32 %s127_s14, 4  ;;  %p4311_p11 = pnand %p3617_p2, %p35_p13  ;;  %s4315_s18 = int_to_ptr.vmem [resolvable:$true] %s135_s18 }
  0x28   : > { %s4317_s20 = scalar_lea.sflag [#allocation3], %s123_s3  ;;  %s4102_s22 = scalar_lea.hbm %s4309_s8, 32768 }
  0x29   : > { %p4103_p5 = scmp.ne.s32.totalorder %s4309_s8, %s4102_s22  ;;  %p4104_p7 = pneg %p4311_p11 }
  0x2a   : > { %s4107_s25 = scalar_lea.hbm %s4824_s0, 65536  ;;  %p4108_p10 = scmp.lt.s32.totalorder %s4309_s8, %s4824_s0 }
  0x2b   : > { %p4105_p9 = pnand %p4104_p7, %p4103_p5  ;;  %p4109_p2 = scmp.lt.s32.totalorder %s4107_s25, %s4102_s22 }
  0x2d   : > { %p4106_p12 = pneg %p4105_p9  ;;  %p4110_p13 = por %p4109_p2, %p4108_p10 }
  0x2f   : > { %p4111_p0 = pnand %p4110_p13, %p4106_p12 }
  0x31   : > { %4114 = shalt.err (!%p4111_p0)
}
  0x32   : > { %s4115_s28 = scalar_lea.vmem %s4315_s18, 32768  ;;  %s4203_s3 = smov [#allocation2]  }
  0x33   : > { %p4116_p1 = scmp.ne.s32.totalorder %s4315_s18, %s4115_s28  ;;  %s4120_s4 = sshll.u32 %s4203_s3, 4  ;;  %s4121_s4 = int_to_ptr.vmem [resolvable:$false] %s4120_s4 }
  0x34   : > { %s4122_s5 = scalar_lea.vmem %s4121_s4, 65536  ;;  %p4123_p9 = scmp.lt.s32.totalorder %s4315_s18, %s4121_s4 }
  0x35   : > { %p4118_p6 = pnand %p4116_p1, %p4104_p7  ;;  %p4124_p3 = scmp.lt.s32.totalorder %s4122_s5, %s4115_s28 }
  0x37   : > { %p4119_p5 = pneg %p4118_p6  ;;  %p4125_p4 = por %p4124_p3, %p4123_p9 }
  0x39   : > { %p4126_p8 = pnand %p4125_p4, %p4119_p5 }
  0x3b   : > { %4129 = shalt.err (!%p4126_p8)
}
  0x3c   : > { %s4204_s6 = smov 256   ;;  %s4205_s7 = smov 16  }
  0x3d   : > { %3611 = dma.hbm_to_vmem [thread:$0]  (!%p4311_p11), %s4309_s8, 32768, %s4315_s18, %s4317_s20, %s4204_s6, %s4204_s6, %s4205_s7  }
  0x3e   : > { %p4838_p1 = scmp.ne.s32.totalorder %s4833_s17, 0 }
  0x3f   : > { %s4341_s14 = sand.u32 (!%p4838_p1), 1, %s4190_s10   ;;  %p4839_p4 = scmp.ne.s32.totalorder (!%p4838_p1), %s4831_s15, 0 }
  0x40   : > { %147 = sbr.rel (%p4838_p1) target bundleno = 855 (0x357), region = 28  ;;  %s3297_s22 = sshll.u32 (!%p4838_p1), %s4341_s14, 11 }
  0x41   : > { %s150_s23 = scalar_lea.sflag (!%p4838_p1), [#allocation3], %s4341_s14  ;;  %s4345_s24 = scalar_lea.vmem (!%p4838_p1), [#allocation2], %s3297_s22 }
  0x45   : > { %4173 = dma.done.wait (%p4839_p4), %s150_s23, 32768  }
  0x46   : > { %4175 = vsyncadd (%p4839_p4), %s150_s23, 4294934528  ;;  %p4840_p6 = scmp.eq.s32.totalorder %s4246_s13, 0 }
  0x48   : > { %4177 = dma.done.wait (%p4840_p6), [#allocation6], 4096   ;;  %p4841_p8 = pmov %p4840_p6 }
  0x49   : > { %v4206_v0 = vmov 0   ;;  %v3660_v1 = vld [vmem:[#allocation5 + $0x38] sm:$0xff]   ;;  %v3662_v3 = vld [vmem:[#allocation5 + $0x30] sm:$0xff]   ;;  %v3664_v5 = vld [vmem:[#allocation5 + $0x28] sm:$0xff]   ;;  %s3299_s15 = sshll.u32 %s4341_s14, 10  ;;  %s3595_s8 = sshll.u32 %s4246_s13, 14 }
  0x4a   : > { %4179 = vsyncadd (%p4841_p8), [#allocation6], 4294963200  ;;  %1973 = vmatprep.subr.bf16.mxu0 %v4206_v0  ;;  %2518 = vmatprep.subr.bf16.mxu1 %v4206_v0  ;;  %v3661_v2 = vld [vmem:[#allocation5 + $0xb8] sm:$0xff]   ;;  %v3663_v4 = vld [vmem:[#allocation5 + $0xb0] sm:$0xff]   ;;  %s4490_s17 = scalar_lea.vmem [#allocation7], %s3299_s15  ;;  %s4778_s25 = scalar_lea.hbm %s4826_s2, %s3595_s8 }
  0x4b   : > { %1974 = vmatpush1.bf16.msra.mxu0 %v3660_v1  ;;  %2519 = vmatpush1.bf16.msra.mxu1 %v3661_v2  ;;  %v3665_v6 = vld [vmem:[#allocation5 + $0xa8] sm:$0xff]   ;;  %v3666_v7 = vld [vmem:[#allocation5 + $0x20] sm:$0xff]   ;;  %v3668_v9 = vld [vmem:[#allocation5 + $0x18] sm:$0xff]   ;;  %s3205_s18 = sshll.u32 %s4490_s17, 4  ;;  %s3192_s13 = scalar_lea.sflag [#allocation4], %s4341_s14  ;;  %s4780_s18 = int_to_ptr.vmem [resolvable:$true] %s3205_s18 }
  0x4c   : > { %1975 = vmatprep.subr.bf16.mxu0 %v4206_v0  ;;  %2520 = vmatprep.subr.bf16.mxu1 %v4206_v0  ;;  %v3667_v8 = vld [vmem:[#allocation5 + $0xa0] sm:$0xff]   ;;  %v3669_v10 = vld [vmem:[#allocation5 + $0x98] sm:$0xff]   ;;  %v3670_v11 = vld [vmem:[#allocation5 + $0x10] sm:$0xff]   ;;  %s4130_s26 = scalar_lea.vmem %s4780_s18, 16384  ;;  %p4842_p11 = scmp.ne.s32.totalorder %s4836_s30, 0 }
  0x4d   : > { %v3671_v12 = vld [vmem:[#allocation5 + $0x90] sm:$0xff]   ;;  %v3672_v13 = vld [vmem:[#allocation5 + $0x8] sm:$0xff]   ;;  %v3674_v15 = vld [vmem:[#allocation5] sm:$0xff]   ;;  %p4131_p3 = scmp.ne.s32.totalorder %s4780_s18, %s4130_s26  ;;  %s4207_s27 = smov [#allocation7]  }
  0x4e   : > { %v3673_v14 = vld [vmem:[#allocation5 + $0x88] sm:$0xff]   ;;  %v3675_v16 = vld [vmem:[#allocation5 + $0x80] sm:$0xff]   ;;  %v3676_v17 = vld [vmem:[#allocation5 + $0x78] sm:$0xff]   ;;  %s4134_s28 = sshll.u32 %s4207_s27, 4  ;;  %s4135_s28 = int_to_ptr.vmem [resolvable:$false] %s4134_s28 }
  0x4f   : > { %1976 = vmatpush1.bf16.msra.mxu0 %v3662_v3  ;;  %2521 = vmatpush1.bf16.msra.mxu1 %v3663_v4  ;;  %v3677_v18 = vld [vmem:[#allocation5 + $0xf8] sm:$0xff]   ;;  %v3694_v19 = vld [vmem:[%s4345_s24 + $0x4] ss:$16 sps:$4 sm:$0xff]   ;;  %v3680_v23 = vld [vmem:[#allocation5 + $0x68] sm:$0xff]   ;;  %p4132_p7 = pnand %p4131_p3, %p4842_p11  ;;  %s4136_s3 = scalar_lea.vmem %s4135_s28, 32768 }
  0x50   : > { %1977 = vmatprep.subr.bf16.mxu0 %v4206_v0  ;;  %2522 = vmatprep.subr.bf16.mxu1 %v4206_v0  ;;  %v3678_v20 = vld [vmem:[#allocation5 + $0x70] sm:$0xff]   ;;  %v3697_v21 = vld [vmem:[%s4345_s24 + $0xc] ss:$16 sps:$4 sm:$0xff]   ;;  %v3682_v25 = vld [vmem:[#allocation5 + $0x60] sm:$0xff]   ;;  %p4137_p10 = scmp.lt.s32.totalorder %s4780_s18, %s4135_s28  ;;  %p4138_p2 = scmp.lt.s32.totalorder %s4136_s3, %s4130_s26 }
  0x51   : > { %v3679_v22 = vld [vmem:[#allocation5 + $0xf0] sm:$0xff]   ;;  %2005 = vmatprep.mubr.bf16.mxu0 %v3694_v19  ;;  %2550 = vmatprep.mubr.bf16.mxu1 %v3697_v21  ;;  %v3681_v24 = vld [vmem:[#allocation5 + $0xe8] sm:$0xff]   ;;  %v3683_v26 = vld [vmem:[#allocation5 + $0xe0] sm:$0xff]   ;;  %p4133_p12 = pneg %p4132_p7 }
  0x52   : > { %v3684_v27 = vld [vmem:[#allocation5 + $0x58] sm:$0xff]   ;;  %v3686_v29 = vld [vmem:[#allocation5 + $0x50] sm:$0xff]   ;;  %v3688_v31 = vld [vmem:[#allocation5 + $0x48] sm:$0xff]   ;;  %p4139_p13 = por %p4138_p2, %p4137_p10 }
  0x53   : > { %1978 = vmatpush1.bf16.msra.mxu0 %v3664_v5  ;;  %2523 = vmatpush1.bf16.msra.mxu1 %v3665_v6  ;;  %v3685_v28 = vld [vmem:[#allocation5 + $0xd8] sm:$0xff]   ;;  %v3687_v30 = vld [vmem:[#allocation5 + $0xd0] sm:$0xff]   ;;  %v3689_v32 = vld [vmem:[#allocation5 + $0xc8] sm:$0xff]  }
  0x54   : > { %1979 = vmatprep.subr.bf16.mxu0 %v4206_v0  ;;  %2524 = vmatprep.subr.bf16.mxu1 %v4206_v0  ;;  %v3690_v33 = vld [vmem:[#allocation5 + $0x40] sm:$0xff]   ;;  %v3695_v36 = vld [vmem:[%s4345_s24 + $0x8] ss:$16 sps:$4 sm:$0xff]   ;;  %v3700_v38 = vld [vmem:[%s4345_s24 + $0x2c] ss:$16 sps:$4 sm:$0xff]   ;;  %p4140_p0 = pnand %p4139_p13, %p4133_p12 }
  0x55   : > { %v3691_v34 = vld [vmem:[#allocation5 + $0xc0] sm:$0xff]   ;;  %v3703_v40 = vld [vmem:[%s4345_s24 + $0x28] ss:$16 sps:$4 sm:$0xff]   ;;  %v3706_v42 = vld [vmem:[%s4345_s24 + $0x4c] ss:$16 sps:$4 sm:$0xff]  }
  0x56   : > { %v3692_v35 = vld [vmem:[%s4345_s24] ss:$16 sps:$4 sm:$0xff]   ;;  %v3698_v37 = vld [vmem:[%s4345_s24 + $0x24] ss:$16 sps:$4 sm:$0xff]   ;;  %v3709_v44 = vld [vmem:[%s4345_s24 + $0x48] ss:$16 sps:$4 sm:$0xff]  }
  0x57   : > { %1980 = vmatpush1.bf16.msra.mxu0 %v3666_v7  ;;  %2525 = vmatpush1.bf16.msra.mxu1 %v3667_v8  ;;  %v3702_v39 = vld [vmem:[%s4345_s24 + $0x20] ss:$16 sps:$4 sm:$0xff]   ;;  %v3704_v41 = vld [vmem:[%s4345_s24 + $0x44] ss:$16 sps:$4 sm:$0xff]   ;;  %v3712_v46 = vld [vmem:[%s4345_s24 + $0x6c] ss:$16 sps:$4 sm:$0xff]  }
  0x58   : > { %1981 = vmatprep.subr.bf16.mxu0 %v4206_v0  ;;  %2526 = vmatprep.subr.bf16.mxu1 %v4206_v0  ;;  %v3708_v43 = vld [vmem:[%s4345_s24 + $0x40] ss:$16 sps:$4 sm:$0xff]   ;;  %v3710_v45 = vld [vmem:[%s4345_s24 + $0x64] ss:$16 sps:$4 sm:$0xff]   ;;  %v3715_v48 = vld [vmem:[%s4345_s24 + $0x68] ss:$16 sps:$4 sm:$0xff]  }
  0x59   : > { %v3714_v47 = vld [vmem:[%s4345_s24 + $0x60] ss:$16 sps:$4 sm:$0xff]   ;;  %v3716_v49 = vld [vmem:[%s4345_s24 + $0x84] ss:$16 sps:$4 sm:$0xff]   ;;  %v3718_v50 = vld [vmem:[%s4345_s24 + $0x8c] ss:$16 sps:$4 sm:$0xff]  }
  0x5a   : > { %v3720_v51 = vld [vmem:[%s4345_s24 + $0x80] ss:$16 sps:$4 sm:$0xff]   ;;  %v3721_v52 = vld [vmem:[%s4345_s24 + $0x88] ss:$16 sps:$4 sm:$0xff]   ;;  %v3722_v53 = vld [vmem:[%s4345_s24 + $0xa4] ss:$16 sps:$4 sm:$0xff]  }
  0x5b   : > { %1982 = vmatpush1.bf16.msra.mxu0 %v3668_v9  ;;  %2527 = vmatpush1.bf16.msra.mxu1 %v3669_v10  ;;  %v3724_v54 = vld [vmem:[%s4345_s24 + $0xac] ss:$16 sps:$4 sm:$0xff]   ;;  %v3726_v55 = vld [vmem:[%s4345_s24 + $0xa0] ss:$16 sps:$4 sm:$0xff]   ;;  %v3727_v56 = vld [vmem:[%s4345_s24 + $0xa8] ss:$16 sps:$4 sm:$0xff]  }
  0x5c   : > { %1983 = vmatprep.subr.bf16.mxu0 %v4206_v0  ;;  %2528 = vmatprep.subr.bf16.mxu1 %v4206_v0  ;;  %v3728_v57 = vld [vmem:[%s4345_s24 + $0xc4] ss:$16 sps:$4 sm:$0xff]   ;;  %v3730_v58 = vld [vmem:[%s4345_s24 + $0xcc] ss:$16 sps:$4 sm:$0xff]   ;;  %v3732_v59 = vld [vmem:[%s4345_s24 + $0xc0] ss:$16 sps:$4 sm:$0xff]  }
  0x5d   : > { %v3733_v60 = vld [vmem:[%s4345_s24 + $0xc8] ss:$16 sps:$4 sm:$0xff]   ;;  %v3734_v61 = vld [vmem:[%s4345_s24 + $0xe4] ss:$16 sps:$4 sm:$0xff]   ;;  %v3736_v62 = vld [vmem:[%s4345_s24 + $0xec] ss:$16 sps:$4 sm:$0xff]  }
  0x5e   : > { %v3738_v63 = vld [vmem:[%s4345_s24 + $0xe0] ss:$16 sps:$4 sm:$0xff]   ;;  %v3740_v1 = vld [vmem:[%s4345_s24 + $0x104] ss:$16 sps:$4 sm:$0xff]   ;;  %v3742_v2 = vld [vmem:[%s4345_s24 + $0x10c] ss:$16 sps:$4 sm:$0xff]  }
  0x5f   : > { %1984 = vmatpush1.bf16.msra.mxu0 %v3670_v11  ;;  %2529 = vmatpush1.bf16.msra.mxu1 %v3671_v12  ;;  %v3744_v3 = vld [vmem:[%s4345_s24 + $0x100] ss:$16 sps:$4 sm:$0xff]   ;;  %v3745_v4 = vld [vmem:[%s4345_s24 + $0x108] ss:$16 sps:$4 sm:$0xff]   ;;  %v3746_v5 = vld [vmem:[%s4345_s24 + $0x124] ss:$16 sps:$4 sm:$0xff]  }
  0x60   : > { %1985 = vmatprep.subr.bf16.mxu0 %v4206_v0  ;;  %2530 = vmatprep.subr.bf16.mxu1 %v4206_v0  ;;  %v3748_v6 = vld [vmem:[%s4345_s24 + $0x12c] ss:$16 sps:$4 sm:$0xff]   ;;  %v3750_v7 = vld [vmem:[%s4345_s24 + $0x120] ss:$16 sps:$4 sm:$0xff]   ;;  %v3751_v8 = vld [vmem:[%s4345_s24 + $0x128] ss:$16 sps:$4 sm:$0xff]  }
  0x61   : > { %v3752_v9 = vld [vmem:[%s4345_s24 + $0x144] ss:$16 sps:$4 sm:$0xff]   ;;  %v3754_v10 = vld [vmem:[%s4345_s24 + $0x14c] ss:$16 sps:$4 sm:$0xff]   ;;  %v3756_v11 = vld [vmem:[%s4345_s24 + $0x140] ss:$16 sps:$4 sm:$0xff]  }
  0x62   : > { %v3757_v12 = vld [vmem:[%s4345_s24 + $0x148] ss:$16 sps:$4 sm:$0xff]   ;;  %v3768_v19 = vld [vmem:[%s4345_s24 + $0x180] ss:$16 sps:$4 sm:$0xff]   ;;  %v3770_v21 = vld [vmem:[%s4345_s24 + $0x1a4] ss:$16 sps:$4 sm:$0xff]  }
  0x63   : > { %1986 = vmatpush1.bf16.msra.mxu0 %v3672_v13  ;;  %2531 = vmatpush1.bf16.msra.mxu1 %v3673_v14  ;;  %v3758_v13 = vld [vmem:[%s4345_s24 + $0x164] ss:$16 sps:$4 sm:$0xff]   ;;  %v3760_v14 = vld [vmem:[%s4345_s24 + $0x16c] ss:$16 sps:$4 sm:$0xff]  }
  0x64   : > { %1987 = vmatprep.subr.bf16.mxu0 %v4206_v0  ;;  %2532 = vmatprep.subr.bf16.mxu1 %v4206_v0 }
  0x67   : > { %1988 = vmatpush1.bf16.msra.mxu0 %v3674_v15  ;;  %2533 = vmatpush1.bf16.msra.mxu1 %v3675_v16  ;;  %v3762_v15 = vld [vmem:[%s4345_s24 + $0x160] ss:$16 sps:$4 sm:$0xff]   ;;  %v3763_v16 = vld [vmem:[%s4345_s24 + $0x168] ss:$16 sps:$4 sm:$0xff]  }
  0x68   : > { %1989 = vmatprep.subr.bf16.mxu0 %v4206_v0  ;;  %2534 = vmatprep.subr.bf16.mxu1 %v4206_v0 }
  0x6b   : > { %1990 = vmatpush2.bf16.msra.mxu0 %v3676_v17  ;;  %2535 = vmatpush2.bf16.msra.mxu1 %v3677_v18  ;;  %v3764_v17 = vld [vmem:[%s4345_s24 + $0x184] ss:$16 sps:$4 sm:$0xff]   ;;  %v3766_v18 = vld [vmem:[%s4345_s24 + $0x18c] ss:$16 sps:$4 sm:$0xff]  }
  0x6c   : > { %1991 = vmatprep.subr.bf16.mxu0 %v4206_v0  ;;  %2536 = vmatprep.subr.bf16.mxu1 %v4206_v0 }
  0x6f   : > { %1992 = vmatpush2.bf16.msra.mxu0 %v3678_v20  ;;  %2537 = vmatpush2.bf16.msra.mxu1 %v3679_v22  ;;  %v3769_v20 = vld [vmem:[%s4345_s24 + $0x188] ss:$16 sps:$4 sm:$0xff]   ;;  %v3772_v22 = vld [vmem:[%s4345_s24 + $0x1ac] ss:$16 sps:$4 sm:$0xff]  }
  0x70   : > { %1993 = vmatprep.subr.bf16.mxu0 %v4206_v0  ;;  %2538 = vmatprep.subr.bf16.mxu1 %v4206_v0 }
  0x73   : > { %1994 = vmatpush2.bf16.msra.mxu0 %v3680_v23  ;;  %2539 = vmatpush2.bf16.msra.mxu1 %v3681_v24  ;;  %v3774_v23 = vld [vmem:[%s4345_s24 + $0x1a0] ss:$16 sps:$4 sm:$0xff]   ;;  %v3775_v24 = vld [vmem:[%s4345_s24 + $0x1a8] ss:$16 sps:$4 sm:$0xff]  }
  0x74   : > { %1995 = vmatprep.subr.bf16.mxu0 %v4206_v0  ;;  %2540 = vmatprep.subr.bf16.mxu1 %v4206_v0 }
  0x77   : > { %1996 = vmatpush2.bf16.msra.mxu0 %v3682_v25  ;;  %2541 = vmatpush2.bf16.msra.mxu1 %v3683_v26  ;;  %v3776_v25 = vld [vmem:[%s4345_s24 + $0x1c4] ss:$16 sps:$4 sm:$0xff]   ;;  %v3778_v26 = vld [vmem:[%s4345_s24 + $0x1cc] ss:$16 sps:$4 sm:$0xff]  }
  0x78   : > { %1997 = vmatprep.subr.bf16.mxu0 %v4206_v0  ;;  %2542 = vmatprep.subr.bf16.mxu1 %v4206_v0 }
  0x7b   : > { %1998 = vmatpush2.bf16.msra.mxu0 %v3684_v27  ;;  %2543 = vmatpush2.bf16.msra.mxu1 %v3685_v28  ;;  %v3780_v27 = vld [vmem:[%s4345_s24 + $0x1c0] ss:$16 sps:$4 sm:$0xff]   ;;  %v3781_v28 = vld [vmem:[%s4345_s24 + $0x1c8] ss:$16 sps:$4 sm:$0xff]  }
  0x7c   : > { %1999 = vmatprep.subr.bf16.mxu0 %v4206_v0  ;;  %2544 = vmatprep.subr.bf16.mxu1 %v4206_v0 }
  0x7f   : > { %2000 = vmatpush2.bf16.msra.mxu0 %v3686_v29  ;;  %2545 = vmatpush2.bf16.msra.mxu1 %v3687_v30  ;;  %v3782_v29 = vld [vmem:[%s4345_s24 + $0x1e4] ss:$16 sps:$4 sm:$0xff]   ;;  %v3784_v30 = vld [vmem:[%s4345_s24 + $0x1ec] ss:$16 sps:$4 sm:$0xff]  }
  0x80   : > { %2001 = vmatprep.subr.bf16.mxu0 %v4206_v0  ;;  %2546 = vmatprep.subr.bf16.mxu1 %v4206_v0 }
  0x83   : > { %2002 = vmatpush2.bf16.msra.mxu0 %v3688_v31  ;;  %2547 = vmatpush2.bf16.msra.mxu1 %v3689_v32  ;;  %v3786_v31 = vld [vmem:[%s4345_s24 + $0x1e0] ss:$16 sps:$4 sm:$0xff]   ;;  %v3787_v32 = vld [vmem:[%s4345_s24 + $0x1e8] ss:$16 sps:$4 sm:$0xff]  }
  0x84   : > { %2003 = vmatprep.subr.bf16.mxu0 %v4206_v0  ;;  %2548 = vmatprep.subr.bf16.mxu1 %v4206_v0  ;;  %v3739_v0 = vld [vmem:[%s4345_s24 + $0xe8] ss:$16 sps:$4 sm:$0xff]  }
  0x87   : > { %2004 = vmatpush2.bf16.msra.mxu0 %v3690_v33  ;;  %2549 = vmatpush2.bf16.msra.mxu1 %v3691_v34  ;;  %v3788_v33 = vld [vmem:[%s4345_s24 + $0x204] ss:$16 sps:$4 sm:$0xff]   ;;  %v3790_v34 = vld [vmem:[%s4345_s24 + $0x20c] ss:$16 sps:$4 sm:$0xff]  }
  0x8a   : > { %2006 = vmatmul.mubr.bf16.vlgmr.msra.gmra.mxu0 %v3692_v35  ;;  %2551 = vmatmul.mubr.bf16.vlgmr.msra.gmra.mxu1 %v3695_v36  ;;  %v3792_v35 = vld [vmem:[%s4345_s24 + $0x200] ss:$16 sps:$4 sm:$0xff]   ;;  %v3793_v36 = vld [vmem:[%s4345_s24 + $0x208] ss:$16 sps:$4 sm:$0xff]  }
  0x8b   : > { %2013 = vmatprep.mubr.bf16.mxu0 %v3698_v37  ;;  %2558 = vmatprep.mubr.bf16.mxu1 %v3700_v38  ;;  %v3794_v37 = vld [vmem:[%s4345_s24 + $0x224] ss:$16 sps:$4 sm:$0xff]   ;;  %v3796_v38 = vld [vmem:[%s4345_s24 + $0x22c] ss:$16 sps:$4 sm:$0xff]  }
  0x92   : > { %2014 = vmatmul.mubr.bf16.gmra.mxu0 %v3702_v39  ;;  %2559 = vmatmul.mubr.bf16.gmra.mxu1 %v3703_v40  ;;  %v3798_v39 = vld [vmem:[%s4345_s24 + $0x220] ss:$16 sps:$4 sm:$0xff]   ;;  %v3799_v40 = vld [vmem:[%s4345_s24 + $0x228] ss:$16 sps:$4 sm:$0xff]  }
  0x93   : > { %2021 = vmatprep.mubr.bf16.mxu0 %v3704_v41  ;;  %2566 = vmatprep.mubr.bf16.mxu1 %v3706_v42  ;;  %v3800_v41 = vld [vmem:[%s4345_s24 + $0x244] ss:$16 sps:$4 sm:$0xff]   ;;  %v3802_v42 = vld [vmem:[%s4345_s24 + $0x24c] ss:$16 sps:$4 sm:$0xff]  }
  0x9a   : > { %2022 = vmatmul.mubr.bf16.gmra.mxu0 %v3708_v43  ;;  %2567 = vmatmul.mubr.bf16.gmra.mxu1 %v3709_v44  ;;  %v3804_v43 = vld [vmem:[%s4345_s24 + $0x240] ss:$16 sps:$4 sm:$0xff]   ;;  %v3805_v44 = vld [vmem:[%s4345_s24 + $0x248] ss:$16 sps:$4 sm:$0xff]  }
  0x9b   : > { %2029 = vmatprep.mubr.bf16.mxu0 %v3710_v45  ;;  %2574 = vmatprep.mubr.bf16.mxu1 %v3712_v46  ;;  %v3806_v45 = vld [vmem:[%s4345_s24 + $0x264] ss:$16 sps:$4 sm:$0xff]   ;;  %v3808_v46 = vld [vmem:[%s4345_s24 + $0x26c] ss:$16 sps:$4 sm:$0xff]  }
  0xa2   : > { %2030 = vmatmul.mubr.bf16.gmra.mxu0 %v3714_v47  ;;  %2575 = vmatmul.mubr.bf16.gmra.mxu1 %v3715_v48  ;;  %v3810_v47 = vld [vmem:[%s4345_s24 + $0x260] ss:$16 sps:$4 sm:$0xff]   ;;  %v3811_v48 = vld [vmem:[%s4345_s24 + $0x268] ss:$16 sps:$4 sm:$0xff]  }
  0xa3   : > { %2037 = vmatprep.mubr.bf16.mxu0 %v3716_v49  ;;  %2582 = vmatprep.mubr.bf16.mxu1 %v3718_v50  ;;  %v3812_v49 = vld [vmem:[%s4345_s24 + $0x284] ss:$16 sps:$4 sm:$0xff]   ;;  %v3814_v50 = vld [vmem:[%s4345_s24 + $0x28c] ss:$16 sps:$4 sm:$0xff]  }
  0xaa   : > { %2038 = vmatmul.mubr.bf16.gmra.mxu0 %v3720_v51  ;;  %2583 = vmatmul.mubr.bf16.gmra.mxu1 %v3721_v52  ;;  %v3816_v51 = vld [vmem:[%s4345_s24 + $0x280] ss:$16 sps:$4 sm:$0xff]   ;;  %v3817_v52 = vld [vmem:[%s4345_s24 + $0x288] ss:$16 sps:$4 sm:$0xff]  }
  0xab   : > { %2045 = vmatprep.mubr.bf16.mxu0 %v3722_v53  ;;  %2590 = vmatprep.mubr.bf16.mxu1 %v3724_v54  ;;  %v3818_v53 = vld [vmem:[%s4345_s24 + $0x2a4] ss:$16 sps:$4 sm:$0xff]   ;;  %v3820_v54 = vld [vmem:[%s4345_s24 + $0x2ac] ss:$16 sps:$4 sm:$0xff]  }
  0xb2   : > { %2046 = vmatmul.mubr.bf16.gmra.mxu0 %v3726_v55  ;;  %2591 = vmatmul.mubr.bf16.gmra.mxu1 %v3727_v56  ;;  %v3822_v55 = vld [vmem:[%s4345_s24 + $0x2a0] ss:$16 sps:$4 sm:$0xff]   ;;  %v3823_v56 = vld [vmem:[%s4345_s24 + $0x2a8] ss:$16 sps:$4 sm:$0xff]  }
  0xb3   : > { %2053 = vmatprep.mubr.bf16.mxu0 %v3728_v57  ;;  %2598 = vmatprep.mubr.bf16.mxu1 %v3730_v58  ;;  %v3824_v57 = vld [vmem:[%s4345_s24 + $0x2c4] ss:$16 sps:$4 sm:$0xff]   ;;  %v3826_v58 = vld [vmem:[%s4345_s24 + $0x2cc] ss:$16 sps:$4 sm:$0xff]  }
  0xba   : > { %2054 = vmatmul.mubr.bf16.gmra.mxu0 %v3732_v59  ;;  %2599 = vmatmul.mubr.bf16.gmra.mxu1 %v3733_v60  ;;  %v3828_v59 = vld [vmem:[%s4345_s24 + $0x2c0] ss:$16 sps:$4 sm:$0xff]   ;;  %v3829_v60 = vld [vmem:[%s4345_s24 + $0x2c8] ss:$16 sps:$4 sm:$0xff]  }
  0xbb   : > { %2061 = vmatprep.mubr.bf16.mxu0 %v3734_v61  ;;  %2606 = vmatprep.mubr.bf16.mxu1 %v3736_v62  ;;  %v3830_v61 = vld [vmem:[%s4345_s24 + $0x2e4] ss:$16 sps:$4 sm:$0xff]   ;;  %v3832_v62 = vld [vmem:[%s4345_s24 + $0x2ec] ss:$16 sps:$4 sm:$0xff]  }
  0xc2   : > { %2062 = vmatmul.mubr.bf16.gmra.mxu0 %v3738_v63  ;;  %2607 = vmatmul.mubr.bf16.gmra.mxu1 %v3739_v0  ;;  %v3834_v63 = vld [vmem:[%s4345_s24 + $0x2e0] ss:$16 sps:$4 sm:$0xff]   ;;  %v3835_v0 = vld [vmem:[%s4345_s24 + $0x2e8] ss:$16 sps:$4 sm:$0xff]  }
  0xc3   : > { %2069 = vmatprep.mubr.bf16.mxu0 %v3740_v1  ;;  %2614 = vmatprep.mubr.bf16.mxu1 %v3742_v2  ;;  %v3836_v1 = vld [vmem:[%s4345_s24 + $0x304] ss:$16 sps:$4 sm:$0xff]   ;;  %v3838_v2 = vld [vmem:[%s4345_s24 + $0x30c] ss:$16 sps:$4 sm:$0xff]  }
  0xca   : > { %2070 = vmatmul.mubr.bf16.gmra.mxu0 %v3744_v3  ;;  %2615 = vmatmul.mubr.bf16.gmra.mxu1 %v3745_v4  ;;  %v3840_v3 = vld [vmem:[%s4345_s24 + $0x300] ss:$16 sps:$4 sm:$0xff]   ;;  %v3841_v4 = vld [vmem:[%s4345_s24 + $0x308] ss:$16 sps:$4 sm:$0xff]  }
  0xcb   : > { %2077 = vmatprep.mubr.bf16.mxu0 %v3746_v5  ;;  %2622 = vmatprep.mubr.bf16.mxu1 %v3748_v6  ;;  %v3842_v5 = vld [vmem:[%s4345_s24 + $0x324] ss:$16 sps:$4 sm:$0xff]   ;;  %v3844_v6 = vld [vmem:[%s4345_s24 + $0x32c] ss:$16 sps:$4 sm:$0xff]  }
  0xd2   : > { %2078 = vmatmul.mubr.bf16.gmra.mxu0 %v3750_v7  ;;  %2623 = vmatmul.mubr.bf16.gmra.mxu1 %v3751_v8 }
  0xd3   : > { %2085 = vmatprep.mubr.bf16.mxu0 %v3752_v9  ;;  %2630 = vmatprep.mubr.bf16.mxu1 %v3754_v10 }
  0xda   : > { %2086 = vmatmul.mubr.bf16.gmra.mxu0 %v3756_v11  ;;  %2631 = vmatmul.mubr.bf16.gmra.mxu1 %v3757_v12 }
  0xdb   : > { %2093 = vmatprep.mubr.bf16.mxu0 %v3758_v13  ;;  %2638 = vmatprep.mubr.bf16.mxu1 %v3760_v14  ;;  %v3846_v13 = vld [vmem:[%s4345_s24 + $0x320] ss:$16 sps:$4 sm:$0xff]  }
  0xe2   : > { %2094 = vmatmul.mubr.bf16.gmra.mxu0 %v3762_v15  ;;  %2639 = vmatmul.mubr.bf16.gmra.mxu1 %v3763_v16  ;;  %v3847_v15 = vld [vmem:[%s4345_s24 + $0x328] ss:$16 sps:$4 sm:$0xff]   ;;  %v3848_v16 = vld [vmem:[%s4345_s24 + $0x344] ss:$16 sps:$4 sm:$0xff]  }
  0xe3   : > { %2101 = vmatprep.mubr.bf16.mxu0 %v3764_v17  ;;  %2646 = vmatprep.mubr.bf16.mxu1 %v3766_v18 }
  0xea   : > { %2102 = vmatmul.mubr.bf16.gmra.mxu0 %v3768_v19  ;;  %2647 = vmatmul.mubr.bf16.gmra.mxu1 %v3769_v20  ;;  %v3850_v19 = vld [vmem:[%s4345_s24 + $0x34c] ss:$16 sps:$4 sm:$0xff]  }
  0xeb   : > { %2109 = vmatprep.mubr.bf16.mxu0 %v3770_v21  ;;  %2654 = vmatprep.mubr.bf16.mxu1 %v3772_v22 }
  0xf2   : > { %2110 = vmatmul.mubr.bf16.gmra.mxu0 %v3774_v23  ;;  %2655 = vmatmul.mubr.bf16.gmra.mxu1 %v3775_v24 }
  0xf3   : > { %2117 = vmatprep.mubr.bf16.mxu0 %v3776_v25  ;;  %2662 = vmatprep.mubr.bf16.mxu1 %v3778_v26 }
  0xfa   : > { %2118 = vmatmul.mubr.bf16.gmra.mxu0 %v3780_v27  ;;  %2663 = vmatmul.mubr.bf16.gmra.mxu1 %v3781_v28  ;;  %v3852_v27 = vld [vmem:[%s4345_s24 + $0x340] ss:$16 sps:$4 sm:$0xff]  }
  0xfb   : > { %2125 = vmatprep.mubr.bf16.mxu0 %v3782_v29  ;;  %2670 = vmatprep.mubr.bf16.mxu1 %v3784_v30  ;;  %v3853_v29 = vld [vmem:[%s4345_s24 + $0x348] ss:$16 sps:$4 sm:$0xff]   ;;  %v3854_v30 = vld [vmem:[%s4345_s24 + $0x364] ss:$16 sps:$4 sm:$0xff]  }
 0x102   : > { %2126 = vmatmul.mubr.bf16.gmra.mxu0 %v3786_v31  ;;  %2671 = vmatmul.mubr.bf16.gmra.mxu1 %v3787_v32 }
 0x103   : > { %2133 = vmatprep.mubr.bf16.mxu0 %v3788_v33  ;;  %2678 = vmatprep.mubr.bf16.mxu1 %v3790_v34  ;;  %v3856_v33 = vld [vmem:[%s4345_s24 + $0x36c] ss:$16 sps:$4 sm:$0xff]  }
 0x10a   : > { %2134 = vmatmul.mubr.bf16.gmra.mxu0 %v3792_v35  ;;  %2679 = vmatmul.mubr.bf16.gmra.mxu1 %v3793_v36 }
 0x10b   : > { %2141 = vmatprep.mubr.bf16.mxu0 %v3794_v37  ;;  %2686 = vmatprep.mubr.bf16.mxu1 %v3796_v38 }
 0x112   : > { %2142 = vmatmul.mubr.bf16.gmra.mxu0 %v3798_v39  ;;  %2687 = vmatmul.mubr.bf16.gmra.mxu1 %v3799_v40 }
 0x113   : > { %2149 = vmatprep.mubr.bf16.mxu0 %v3800_v41  ;;  %2694 = vmatprep.mubr.bf16.mxu1 %v3802_v42  ;;  %v3858_v41 = vld [vmem:[%s4345_s24 + $0x360] ss:$16 sps:$4 sm:$0xff]  }
 0x11a   : > { %2150 = vmatmul.mubr.bf16.gmra.mxu0 %v3804_v43  ;;  %2695 = vmatmul.mubr.bf16.gmra.mxu1 %v3805_v44  ;;  %v3859_v43 = vld [vmem:[%s4345_s24 + $0x368] ss:$16 sps:$4 sm:$0xff]   ;;  %v3862_v44 = vld [vmem:[%s4345_s24 + $0x384] ss:$16 sps:$4 sm:$0xff]  }
 0x11b   : > { %2157 = vmatprep.mubr.bf16.mxu0 %v3806_v45  ;;  %2702 = vmatprep.mubr.bf16.mxu1 %v3808_v46 }
 0x122   : > { %2158 = vmatmul.mubr.bf16.gmra.mxu0 %v3810_v47  ;;  %2703 = vmatmul.mubr.bf16.gmra.mxu1 %v3811_v48  ;;  %v3865_v47 = vld [vmem:[%s4345_s24 + $0x38c] ss:$16 sps:$4 sm:$0xff]  }
 0x123   : > { %2165 = vmatprep.mubr.bf16.mxu0 %v3812_v49  ;;  %2710 = vmatprep.mubr.bf16.mxu1 %v3814_v50 }
 0x12a   : > { %2166 = vmatmul.mubr.bf16.gmra.mxu0 %v3816_v51  ;;  %2711 = vmatmul.mubr.bf16.gmra.mxu1 %v3817_v52 }
 0x12b   : > { %2173 = vmatprep.mubr.bf16.mxu0 %v3818_v53  ;;  %2718 = vmatprep.mubr.bf16.mxu1 %v3820_v54 }
 0x132   : > { %2174 = vmatmul.mubr.bf16.gmra.mxu0 %v3822_v55  ;;  %2719 = vmatmul.mubr.bf16.gmra.mxu1 %v3823_v56  ;;  %v3860_v55 = vld [vmem:[%s4345_s24 + $0x380] ss:$16 sps:$4 sm:$0xff]  }
 0x133   : > { %2181 = vmatprep.mubr.bf16.mxu0 %v3824_v57  ;;  %2726 = vmatprep.mubr.bf16.mxu1 %v3826_v58  ;;  %v3863_v57 = vld [vmem:[%s4345_s24 + $0x388] ss:$16 sps:$4 sm:$0xff]   ;;  %v3868_v58 = vld [vmem:[%s4345_s24 + $0x3a4] ss:$16 sps:$4 sm:$0xff]  }
 0x13a   : > { %2182 = vmatmul.mubr.bf16.gmra.mxu0 %v3828_v59  ;;  %2727 = vmatmul.mubr.bf16.gmra.mxu1 %v3829_v60 }
 0x13b   : > { %2189 = vmatprep.mubr.bf16.mxu0 %v3830_v61  ;;  %2734 = vmatprep.mubr.bf16.mxu1 %v3832_v62  ;;  %v3871_v61 = vld [vmem:[%s4345_s24 + $0x3ac] ss:$16 sps:$4 sm:$0xff]  }
 0x142   : > { %2190 = vmatmul.mubr.bf16.gmra.mxu0 %v3834_v63  ;;  %2735 = vmatmul.mubr.bf16.gmra.mxu1 %v3835_v0 }
 0x143   : > { %2197 = vmatprep.mubr.bf16.mxu0 %v3836_v1  ;;  %2742 = vmatprep.mubr.bf16.mxu1 %v3838_v2 }
 0x14a   : > { %v2007_v7 = vpop.f32.mrf.mxu0  ;;  %2198 = vmatmul.mubr.bf16.gmra.mxu0 %v3840_v3  ;;  %v2552_v8 = vpop.f32.mrf.mxu1  ;;  %2743 = vmatmul.mubr.bf16.gmra.mxu1 %v3841_v4 }
 0x14b   : > { %2205 = vmatprep.mubr.bf16.mxu0 %v3842_v5  ;;  %v2553_v9 = vadd.f32 %v2552_v8, %v2007_v7  ;;  %2750 = vmatprep.mubr.bf16.mxu1 %v3844_v6  ;;  %v3866_v5 = vld [vmem:[%s4345_s24 + $0x3a0] ss:$16 sps:$4 sm:$0xff]   ;;  %v3869_v7 = vld [vmem:[%s4345_s24 + $0x3a8] ss:$16 sps:$4 sm:$0xff]   ;;  %v3874_v8 = vld [vmem:[%s4345_s24 + $0x3c4] ss:$16 sps:$4 sm:$0xff]  }
 0x14c   : > { %v2009_v10 = vpop.f32.mrf.mxu0  ;;  %v2554_v11 = vpop.f32.mrf.mxu1 }
 0x14d   : > { %3063 = vst [vmem:[%s4490_s17] sm:$0xff] %v2553_v9  ;;  %v3877_v11 = vld [vmem:[%s4345_s24 + $0x3cc] ss:$16 sps:$4 sm:$0xff]  }
 0x14e   : > { %v2010_v12 = vpop.f32.mrf.mxu0  ;;  %v2555_v14 = vpop.f32.mrf.mxu1 }
 0x14f   : > { %v2556_v17 = vadd.f32 %v2555_v14, %v2010_v12 }
 0x150   : > { %v2012_v18 = vpop.f32.mrf.mxu0  ;;  %v2557_v20 = vpop.f32.mrf.mxu1 }
 0x151   : > { %3064 = vst [vmem:[%s4490_s17 + $0x8] sm:$0xff] %v2556_v17 }
 0x152   : > { %v2015_v21 = vpop.f32.mrf.mxu0  ;;  %2206 = vmatmul.mubr.bf16.gmra.mxu0 %v3846_v13  ;;  %v2560_v22 = vpop.f32.mrf.mxu1  ;;  %2751 = vmatmul.mubr.bf16.gmra.mxu1 %v3847_v15 }
 0x153   : > { %2213 = vmatprep.mubr.bf16.mxu0 %v3848_v16  ;;  %v2561_v23 = vadd.f32 %v2560_v22, %v2015_v21  ;;  %2758 = vmatprep.mubr.bf16.mxu1 %v3850_v19  ;;  %v3872_v19 = vld [vmem:[%s4345_s24 + $0x3c0] ss:$16 sps:$4 sm:$0xff]   ;;  %v3875_v21 = vld [vmem:[%s4345_s24 + $0x3c8] ss:$16 sps:$4 sm:$0xff]   ;;  %v3880_v22 = vld [vmem:[%s4345_s24 + $0x3e4] ss:$16 sps:$4 sm:$0xff]  }
 0x154   : > { %v2017_v24 = vpop.f32.mrf.mxu0  ;;  %v2562_v25 = vpop.f32.mrf.mxu1 }
 0x155   : > { %3065 = vst [vmem:[%s4490_s17 + $0x10] sm:$0xff] %v2561_v23  ;;  %v3883_v25 = vld [vmem:[%s4345_s24 + $0x3ec] ss:$16 sps:$4 sm:$0xff]  }
 0x156   : > { %v2018_v26 = vpop.f32.mrf.mxu0  ;;  %v2563_v28 = vpop.f32.mrf.mxu1 }
 0x157   : > { %v2564_v31 = vadd.f32 %v2563_v28, %v2018_v26 }
 0x158   : > { %v2020_v32 = vpop.f32.mrf.mxu0  ;;  %v2565_v34 = vpop.f32.mrf.mxu1 }
 0x159   : > { %3066 = vst [vmem:[%s4490_s17 + $0x18] sm:$0xff] %v2564_v31 }
 0x15a   : > { %v2023_v35 = vpop.f32.mrf.mxu0  ;;  %2214 = vmatmul.mubr.bf16.gmra.mxu0 %v3852_v27  ;;  %v2568_v36 = vpop.f32.mrf.mxu1  ;;  %2759 = vmatmul.mubr.bf16.gmra.mxu1 %v3853_v29 }
 0x15b   : > { %2221 = vmatprep.mubr.bf16.mxu0 %v3854_v30  ;;  %v2569_v37 = vadd.f32 %v2568_v36, %v2023_v35  ;;  %2766 = vmatprep.mubr.bf16.mxu1 %v3856_v33  ;;  %v3878_v33 = vld [vmem:[%s4345_s24 + $0x3e0] ss:$16 sps:$4 sm:$0xff]   ;;  %v3881_v35 = vld [vmem:[%s4345_s24 + $0x3e8] ss:$16 sps:$4 sm:$0xff]   ;;  %v3886_v36 = vld [vmem:[%s4345_s24 + $0x404] ss:$16 sps:$4 sm:$0xff]  }
 0x15c   : > { %v2025_v38 = vpop.f32.mrf.mxu0  ;;  %v2570_v39 = vpop.f32.mrf.mxu1 }
 0x15d   : > { %3067 = vst [vmem:[%s4490_s17 + $0x20] sm:$0xff] %v2569_v37  ;;  %v3889_v39 = vld [vmem:[%s4345_s24 + $0x40c] ss:$16 sps:$4 sm:$0xff]  }
 0x15e   : > { %v2026_v40 = vpop.f32.mrf.mxu0  ;;  %v2571_v42 = vpop.f32.mrf.mxu1 }
 0x15f   : > { %v2572_v45 = vadd.f32 %v2571_v42, %v2026_v40 }
 0x160   : > { %v2028_v46 = vpop.f32.mrf.mxu0  ;;  %v2573_v48 = vpop.f32.mrf.mxu1 }
 0x161   : > { %3068 = vst [vmem:[%s4490_s17 + $0x28] sm:$0xff] %v2572_v45 }
 0x162   : > { %v2031_v49 = vpop.f32.mrf.mxu0  ;;  %2222 = vmatmul.mubr.bf16.gmra.mxu0 %v3858_v41  ;;  %v2576_v50 = vpop.f32.mrf.mxu1  ;;  %2767 = vmatmul.mubr.bf16.gmra.mxu1 %v3859_v43 }
 0x163   : > { %2229 = vmatprep.mubr.bf16.mxu0 %v3862_v44  ;;  %v2577_v51 = vadd.f32 %v2576_v50, %v2031_v49  ;;  %2774 = vmatprep.mubr.bf16.mxu1 %v3865_v47  ;;  %v3884_v47 = vld [vmem:[%s4345_s24 + $0x400] ss:$16 sps:$4 sm:$0xff]   ;;  %v3887_v49 = vld [vmem:[%s4345_s24 + $0x408] ss:$16 sps:$4 sm:$0xff]   ;;  %v3892_v50 = vld [vmem:[%s4345_s24 + $0x424] ss:$16 sps:$4 sm:$0xff]  }
 0x164   : > { %v2033_v52 = vpop.f32.mrf.mxu0  ;;  %v2578_v53 = vpop.f32.mrf.mxu1 }
 0x165   : > { %3069 = vst [vmem:[%s4490_s17 + $0x30] sm:$0xff] %v2577_v51  ;;  %v3895_v53 = vld [vmem:[%s4345_s24 + $0x42c] ss:$16 sps:$4 sm:$0xff]  }
 0x166   : > { %v2034_v54 = vpop.f32.mrf.mxu0  ;;  %v2579_v56 = vpop.f32.mrf.mxu1 }
 0x167   : > { %v2580_v59 = vadd.f32 %v2579_v56, %v2034_v54 }
 0x168   : > { %v2036_v60 = vpop.f32.mrf.mxu0  ;;  %v2581_v62 = vpop.f32.mrf.mxu1 }
 0x169   : > { %3070 = vst [vmem:[%s4490_s17 + $0x38] sm:$0xff] %v2580_v59 }
 0x16a   : > { %v2039_v63 = vpop.f32.mrf.mxu0  ;;  %2230 = vmatmul.mubr.bf16.gmra.mxu0 %v3860_v55  ;;  %v2584_v0 = vpop.f32.mrf.mxu1  ;;  %2775 = vmatmul.mubr.bf16.gmra.mxu1 %v3863_v57 }
 0x16b   : > { %2237 = vmatprep.mubr.bf16.mxu0 %v3868_v58  ;;  %v2585_v1 = vadd.f32 %v2584_v0, %v2039_v63  ;;  %2782 = vmatprep.mubr.bf16.mxu1 %v3871_v61  ;;  %v3890_v61 = vld [vmem:[%s4345_s24 + $0x420] ss:$16 sps:$4 sm:$0xff]   ;;  %v3893_v63 = vld [vmem:[%s4345_s24 + $0x428] ss:$16 sps:$4 sm:$0xff]   ;;  %v3898_v0 = vld [vmem:[%s4345_s24 + $0x444] ss:$16 sps:$4 sm:$0xff]  }
 0x16c   : > { %v2041_v2 = vpop.f32.mrf.mxu0  ;;  %v2586_v3 = vpop.f32.mrf.mxu1 }
 0x16d   : > { %3071 = vst [vmem:[%s4490_s17 + $0x40] sm:$0xff] %v2585_v1  ;;  %v3901_v3 = vld [vmem:[%s4345_s24 + $0x44c] ss:$16 sps:$4 sm:$0xff]  }
 0x16e   : > { %v2042_v4 = vpop.f32.mrf.mxu0  ;;  %v2587_v6 = vpop.f32.mrf.mxu1 }
 0x16f   : > { %v2588_v9 = vadd.f32 %v2587_v6, %v2042_v4 }
 0x170   : > { %v2044_v10 = vpop.f32.mrf.mxu0  ;;  %v2589_v12 = vpop.f32.mrf.mxu1 }
 0x171   : > { %3072 = vst [vmem:[%s4490_s17 + $0x48] sm:$0xff] %v2588_v9 }
 0x172   : > { %v2047_v13 = vpop.f32.mrf.mxu0  ;;  %2238 = vmatmul.mubr.bf16.gmra.mxu0 %v3866_v5  ;;  %v2592_v14 = vpop.f32.mrf.mxu1  ;;  %2783 = vmatmul.mubr.bf16.gmra.mxu1 %v3869_v7 }
 0x173   : > { %2245 = vmatprep.mubr.bf16.mxu0 %v3874_v8  ;;  %v2593_v15 = vadd.f32 %v2592_v14, %v2047_v13  ;;  %2790 = vmatprep.mubr.bf16.mxu1 %v3877_v11  ;;  %v3896_v11 = vld [vmem:[%s4345_s24 + $0x440] ss:$16 sps:$4 sm:$0xff]   ;;  %v3899_v13 = vld [vmem:[%s4345_s24 + $0x448] ss:$16 sps:$4 sm:$0xff]   ;;  %v3904_v14 = vld [vmem:[%s4345_s24 + $0x464] ss:$16 sps:$4 sm:$0xff]  }
 0x174   : > { %v2049_v16 = vpop.f32.mrf.mxu0  ;;  %v2594_v17 = vpop.f32.mrf.mxu1 }
 0x175   : > { %3073 = vst [vmem:[%s4490_s17 + $0x50] sm:$0xff] %v2593_v15  ;;  %v3907_v17 = vld [vmem:[%s4345_s24 + $0x46c] ss:$16 sps:$4 sm:$0xff]  }
 0x176   : > { %v2050_v18 = vpop.f32.mrf.mxu0  ;;  %v2595_v20 = vpop.f32.mrf.mxu1 }
 0x177   : > { %v2596_v23 = vadd.f32 %v2595_v20, %v2050_v18 }
 0x178   : > { %v2052_v24 = vpop.f32.mrf.mxu0  ;;  %v2597_v26 = vpop.f32.mrf.mxu1 }
 0x179   : > { %3074 = vst [vmem:[%s4490_s17 + $0x58] sm:$0xff] %v2596_v23 }
 0x17a   : > { %v2055_v27 = vpop.f32.mrf.mxu0  ;;  %2246 = vmatmul.mubr.bf16.gmra.mxu0 %v3872_v19  ;;  %v2600_v28 = vpop.f32.mrf.mxu1  ;;  %2791 = vmatmul.mubr.bf16.gmra.mxu1 %v3875_v21 }
 0x17b   : > { %2253 = vmatprep.mubr.bf16.mxu0 %v3880_v22  ;;  %v2601_v29 = vadd.f32 %v2600_v28, %v2055_v27  ;;  %2798 = vmatprep.mubr.bf16.mxu1 %v3883_v25  ;;  %v3902_v25 = vld [vmem:[%s4345_s24 + $0x460] ss:$16 sps:$4 sm:$0xff]   ;;  %v3905_v27 = vld [vmem:[%s4345_s24 + $0x468] ss:$16 sps:$4 sm:$0xff]   ;;  %v3910_v28 = vld [vmem:[%s4345_s24 + $0x484] ss:$16 sps:$4 sm:$0xff]  }
 0x17c   : > { %v2057_v30 = vpop.f32.mrf.mxu0  ;;  %v2602_v31 = vpop.f32.mrf.mxu1 }
 0x17d   : > { %3075 = vst [vmem:[%s4490_s17 + $0x60] sm:$0xff] %v2601_v29  ;;  %v3913_v31 = vld [vmem:[%s4345_s24 + $0x48c] ss:$16 sps:$4 sm:$0xff]  }
 0x17e   : > { %v2058_v32 = vpop.f32.mrf.mxu0  ;;  %v2603_v34 = vpop.f32.mrf.mxu1 }
 0x17f   : > { %v2604_v37 = vadd.f32 %v2603_v34, %v2058_v32 }
 0x180   : > { %v2060_v38 = vpop.f32.mrf.mxu0  ;;  %v2605_v40 = vpop.f32.mrf.mxu1 }
 0x181   : > { %3076 = vst [vmem:[%s4490_s17 + $0x68] sm:$0xff] %v2604_v37 }
 0x182   : > { %v2063_v41 = vpop.f32.mrf.mxu0  ;;  %2254 = vmatmul.mubr.bf16.gmra.mxu0 %v3878_v33  ;;  %v2608_v42 = vpop.f32.mrf.mxu1  ;;  %2799 = vmatmul.mubr.bf16.gmra.mxu1 %v3881_v35 }
 0x183   : > { %2261 = vmatprep.mubr.bf16.mxu0 %v3886_v36  ;;  %v2609_v43 = vadd.f32 %v2608_v42, %v2063_v41  ;;  %2806 = vmatprep.mubr.bf16.mxu1 %v3889_v39  ;;  %v3908_v39 = vld [vmem:[%s4345_s24 + $0x480] ss:$16 sps:$4 sm:$0xff]   ;;  %v3911_v41 = vld [vmem:[%s4345_s24 + $0x488] ss:$16 sps:$4 sm:$0xff]   ;;  %v3916_v42 = vld [vmem:[%s4345_s24 + $0x4a4] ss:$16 sps:$4 sm:$0xff]  }
 0x184   : > { %v2065_v44 = vpop.f32.mrf.mxu0  ;;  %v2610_v45 = vpop.f32.mrf.mxu1 }
 0x185   : > { %3077 = vst [vmem:[%s4490_s17 + $0x70] sm:$0xff] %v2609_v43  ;;  %v3919_v45 = vld [vmem:[%s4345_s24 + $0x4ac] ss:$16 sps:$4 sm:$0xff]  }
 0x186   : > { %v2066_v46 = vpop.f32.mrf.mxu0  ;;  %v2611_v48 = vpop.f32.mrf.mxu1 }
 0x187   : > { %v2612_v51 = vadd.f32 %v2611_v48, %v2066_v46 }
 0x188   : > { %v2068_v52 = vpop.f32.mrf.mxu0  ;;  %v2613_v54 = vpop.f32.mrf.mxu1 }
 0x189   : > { %3078 = vst [vmem:[%s4490_s17 + $0x78] sm:$0xff] %v2612_v51 }
 0x18a   : > { %v2071_v55 = vpop.f32.mrf.mxu0  ;;  %2262 = vmatmul.mubr.bf16.gmra.mxu0 %v3884_v47  ;;  %v2616_v56 = vpop.f32.mrf.mxu1  ;;  %2807 = vmatmul.mubr.bf16.gmra.mxu1 %v3887_v49 }
 0x18b   : > { %2269 = vmatprep.mubr.bf16.mxu0 %v3892_v50  ;;  %v2617_v57 = vadd.f32 %v2616_v56, %v2071_v55  ;;  %2814 = vmatprep.mubr.bf16.mxu1 %v3895_v53  ;;  %v3914_v53 = vld [vmem:[%s4345_s24 + $0x4a0] ss:$16 sps:$4 sm:$0xff]   ;;  %v3917_v55 = vld [vmem:[%s4345_s24 + $0x4a8] ss:$16 sps:$4 sm:$0xff]   ;;  %v3922_v56 = vld [vmem:[%s4345_s24 + $0x4c4] ss:$16 sps:$4 sm:$0xff]  }
 0x18c   : > { %v2073_v58 = vpop.f32.mrf.mxu0  ;;  %v2618_v59 = vpop.f32.mrf.mxu1 }
 0x18d   : > { %3079 = vst [vmem:[%s4490_s17 + $0x80] sm:$0xff] %v2617_v57  ;;  %v3925_v59 = vld [vmem:[%s4345_s24 + $0x4cc] ss:$16 sps:$4 sm:$0xff]  }
 0x18e   : > { %v2074_v60 = vpop.f32.mrf.mxu0  ;;  %v2619_v62 = vpop.f32.mrf.mxu1 }
 0x18f   : > { %v2620_v1 = vadd.f32 %v2619_v62, %v2074_v60 }
 0x190   : > { %v2076_v2 = vpop.f32.mrf.mxu0  ;;  %v2621_v4 = vpop.f32.mrf.mxu1 }
 0x191   : > { %3080 = vst [vmem:[%s4490_s17 + $0x88] sm:$0xff] %v2620_v1 }
 0x192   : > { %v2079_v5 = vpop.f32.mrf.mxu0  ;;  %2270 = vmatmul.mubr.bf16.gmra.mxu0 %v3890_v61  ;;  %v2624_v6 = vpop.f32.mrf.mxu1  ;;  %2815 = vmatmul.mubr.bf16.gmra.mxu1 %v3893_v63 }
 0x193   : > { %2277 = vmatprep.mubr.bf16.mxu0 %v3898_v0  ;;  %v2625_v7 = vadd.f32 %v2624_v6, %v2079_v5  ;;  %2822 = vmatprep.mubr.bf16.mxu1 %v3901_v3  ;;  %v3920_v3 = vld [vmem:[%s4345_s24 + $0x4c0] ss:$16 sps:$4 sm:$0xff]   ;;  %v3923_v5 = vld [vmem:[%s4345_s24 + $0x4c8] ss:$16 sps:$4 sm:$0xff]   ;;  %v3928_v6 = vld [vmem:[%s4345_s24 + $0x4e4] ss:$16 sps:$4 sm:$0xff]  }
 0x194   : > { %v2081_v8 = vpop.f32.mrf.mxu0  ;;  %v2626_v9 = vpop.f32.mrf.mxu1 }
 0x195   : > { %3081 = vst [vmem:[%s4490_s17 + $0x90] sm:$0xff] %v2625_v7  ;;  %v3931_v9 = vld [vmem:[%s4345_s24 + $0x4ec] ss:$16 sps:$4 sm:$0xff]  }
 0x196   : > { %v2082_v10 = vpop.f32.mrf.mxu0  ;;  %v2627_v12 = vpop.f32.mrf.mxu1 }
 0x197   : > { %v2628_v15 = vadd.f32 %v2627_v12, %v2082_v10 }
 0x198   : > { %v2084_v16 = vpop.f32.mrf.mxu0  ;;  %v2629_v18 = vpop.f32.mrf.mxu1 }
 0x199   : > { %3082 = vst [vmem:[%s4490_s17 + $0x98] sm:$0xff] %v2628_v15 }
 0x19a   : > { %v2087_v19 = vpop.f32.mrf.mxu0  ;;  %2278 = vmatmul.mubr.bf16.gmra.mxu0 %v3896_v11  ;;  %v2632_v20 = vpop.f32.mrf.mxu1  ;;  %2823 = vmatmul.mubr.bf16.gmra.mxu1 %v3899_v13 }
 0x19b   : > { %2285 = vmatprep.mubr.bf16.mxu0 %v3904_v14  ;;  %v2633_v21 = vadd.f32 %v2632_v20, %v2087_v19  ;;  %2830 = vmatprep.mubr.bf16.mxu1 %v3907_v17  ;;  %v3926_v17 = vld [vmem:[%s4345_s24 + $0x4e0] ss:$16 sps:$4 sm:$0xff]   ;;  %v3929_v19 = vld [vmem:[%s4345_s24 + $0x4e8] ss:$16 sps:$4 sm:$0xff]   ;;  %v3934_v20 = vld [vmem:[%s4345_s24 + $0x504] ss:$16 sps:$4 sm:$0xff]  }
 0x19c   : > { %v2089_v22 = vpop.f32.mrf.mxu0  ;;  %v2634_v23 = vpop.f32.mrf.mxu1 }
 0x19d   : > { %3083 = vst [vmem:[%s4490_s17 + $0xa0] sm:$0xff] %v2633_v21  ;;  %v3937_v23 = vld [vmem:[%s4345_s24 + $0x50c] ss:$16 sps:$4 sm:$0xff]  }
 0x19e   : > { %v2090_v24 = vpop.f32.mrf.mxu0  ;;  %v2635_v26 = vpop.f32.mrf.mxu1 }
 0x19f   : > { %v2636_v29 = vadd.f32 %v2635_v26, %v2090_v24 }
 0x1a0   : > { %v2092_v30 = vpop.f32.mrf.mxu0  ;;  %v2637_v32 = vpop.f32.mrf.mxu1 }
 0x1a1   : > { %3084 = vst [vmem:[%s4490_s17 + $0xa8] sm:$0xff] %v2636_v29 }
 0x1a2   : > { %v2095_v33 = vpop.f32.mrf.mxu0  ;;  %2286 = vmatmul.mubr.bf16.gmra.mxu0 %v3902_v25  ;;  %v2640_v34 = vpop.f32.mrf.mxu1  ;;  %2831 = vmatmul.mubr.bf16.gmra.mxu1 %v3905_v27 }
 0x1a3   : > { %2293 = vmatprep.mubr.bf16.mxu0 %v3910_v28  ;;  %v2641_v35 = vadd.f32 %v2640_v34, %v2095_v33  ;;  %2838 = vmatprep.mubr.bf16.mxu1 %v3913_v31  ;;  %v3932_v31 = vld [vmem:[%s4345_s24 + $0x500] ss:$16 sps:$4 sm:$0xff]   ;;  %v3935_v33 = vld [vmem:[%s4345_s24 + $0x508] ss:$16 sps:$4 sm:$0xff]   ;;  %v3940_v34 = vld [vmem:[%s4345_s24 + $0x524] ss:$16 sps:$4 sm:$0xff]  }
 0x1a4   : > { %v2097_v36 = vpop.f32.mrf.mxu0  ;;  %v2642_v37 = vpop.f32.mrf.mxu1 }
 0x1a5   : > { %3085 = vst [vmem:[%s4490_s17 + $0xb0] sm:$0xff] %v2641_v35  ;;  %v3943_v37 = vld [vmem:[%s4345_s24 + $0x52c] ss:$16 sps:$4 sm:$0xff]  }
 0x1a6   : > { %v2098_v38 = vpop.f32.mrf.mxu0  ;;  %v2643_v40 = vpop.f32.mrf.mxu1 }
 0x1a7   : > { %v2644_v43 = vadd.f32 %v2643_v40, %v2098_v38 }
 0x1a8   : > { %v2100_v44 = vpop.f32.mrf.mxu0  ;;  %v2645_v46 = vpop.f32.mrf.mxu1 }
 0x1a9   : > { %3086 = vst [vmem:[%s4490_s17 + $0xb8] sm:$0xff] %v2644_v43 }
 0x1aa   : > { %v2103_v47 = vpop.f32.mrf.mxu0  ;;  %2294 = vmatmul.mubr.bf16.gmra.mxu0 %v3908_v39  ;;  %v2648_v48 = vpop.f32.mrf.mxu1  ;;  %2839 = vmatmul.mubr.bf16.gmra.mxu1 %v3911_v41 }
 0x1ab   : > { %2301 = vmatprep.mubr.bf16.mxu0 %v3916_v42  ;;  %v2649_v49 = vadd.f32 %v2648_v48, %v2103_v47  ;;  %2846 = vmatprep.mubr.bf16.mxu1 %v3919_v45  ;;  %v3938_v45 = vld [vmem:[%s4345_s24 + $0x520] ss:$16 sps:$4 sm:$0xff]   ;;  %v3941_v47 = vld [vmem:[%s4345_s24 + $0x528] ss:$16 sps:$4 sm:$0xff]   ;;  %v3946_v48 = vld [vmem:[%s4345_s24 + $0x544] ss:$16 sps:$4 sm:$0xff]  }
 0x1ac   : > { %v2105_v50 = vpop.f32.mrf.mxu0  ;;  %v2650_v51 = vpop.f32.mrf.mxu1 }
 0x1ad   : > { %3087 = vst [vmem:[%s4490_s17 + $0xc0] sm:$0xff] %v2649_v49  ;;  %v3949_v51 = vld [vmem:[%s4345_s24 + $0x54c] ss:$16 sps:$4 sm:$0xff]  }
 0x1ae   : > { %v2106_v52 = vpop.f32.mrf.mxu0  ;;  %v2651_v54 = vpop.f32.mrf.mxu1 }
 0x1af   : > { %v2652_v57 = vadd.f32 %v2651_v54, %v2106_v52 }
 0x1b0   : > { %v2108_v58 = vpop.f32.mrf.mxu0  ;;  %v2653_v60 = vpop.f32.mrf.mxu1 }
 0x1b1   : > { %3088 = vst [vmem:[%s4490_s17 + $0xc8] sm:$0xff] %v2652_v57 }
 0x1b2   : > { %v2111_v61 = vpop.f32.mrf.mxu0  ;;  %2302 = vmatmul.mubr.bf16.gmra.mxu0 %v3914_v53  ;;  %v2656_v62 = vpop.f32.mrf.mxu1  ;;  %2847 = vmatmul.mubr.bf16.gmra.mxu1 %v3917_v55 }
 0x1b3   : > { %2309 = vmatprep.mubr.bf16.mxu0 %v3922_v56  ;;  %v2657_v63 = vadd.f32 %v2656_v62, %v2111_v61  ;;  %2854 = vmatprep.mubr.bf16.mxu1 %v3925_v59  ;;  %v3944_v59 = vld [vmem:[%s4345_s24 + $0x540] ss:$16 sps:$4 sm:$0xff]   ;;  %v3947_v61 = vld [vmem:[%s4345_s24 + $0x548] ss:$16 sps:$4 sm:$0xff]   ;;  %v3952_v62 = vld [vmem:[%s4345_s24 + $0x564] ss:$16 sps:$4 sm:$0xff]  }
 0x1b4   : > { %v2113_v0 = vpop.f32.mrf.mxu0  ;;  %v2658_v1 = vpop.f32.mrf.mxu1 }
 0x1b5   : > { %3089 = vst [vmem:[%s4490_s17 + $0xd0] sm:$0xff] %v2657_v63  ;;  %v3955_v1 = vld [vmem:[%s4345_s24 + $0x56c] ss:$16 sps:$4 sm:$0xff]  }
 0x1b6   : > { %v2114_v2 = vpop.f32.mrf.mxu0  ;;  %v2659_v4 = vpop.f32.mrf.mxu1 }
 0x1b7   : > { %v2660_v7 = vadd.f32 %v2659_v4, %v2114_v2 }
 0x1b8   : > { %v2116_v8 = vpop.f32.mrf.mxu0  ;;  %v2661_v10 = vpop.f32.mrf.mxu1 }
 0x1b9   : > { %3090 = vst [vmem:[%s4490_s17 + $0xd8] sm:$0xff] %v2660_v7 }
 0x1ba   : > { %v2119_v11 = vpop.f32.mrf.mxu0  ;;  %2310 = vmatmul.mubr.bf16.gmra.mxu0 %v3920_v3  ;;  %v2664_v12 = vpop.f32.mrf.mxu1  ;;  %2855 = vmatmul.mubr.bf16.gmra.mxu1 %v3923_v5 }
 0x1bb   : > { %2317 = vmatprep.mubr.bf16.mxu0 %v3928_v6  ;;  %v2665_v13 = vadd.f32 %v2664_v12, %v2119_v11  ;;  %2862 = vmatprep.mubr.bf16.mxu1 %v3931_v9  ;;  %v3950_v9 = vld [vmem:[%s4345_s24 + $0x560] ss:$16 sps:$4 sm:$0xff]   ;;  %v3953_v11 = vld [vmem:[%s4345_s24 + $0x568] ss:$16 sps:$4 sm:$0xff]   ;;  %v3958_v12 = vld [vmem:[%s4345_s24 + $0x584] ss:$16 sps:$4 sm:$0xff]  }
 0x1bc   : > { %v2121_v14 = vpop.f32.mrf.mxu0  ;;  %v2666_v15 = vpop.f32.mrf.mxu1 }
 0x1bd   : > { %3091 = vst [vmem:[%s4490_s17 + $0xe0] sm:$0xff] %v2665_v13  ;;  %v3961_v15 = vld [vmem:[%s4345_s24 + $0x58c] ss:$16 sps:$4 sm:$0xff]  }
 0x1be   : > { %v2122_v16 = vpop.f32.mrf.mxu0  ;;  %v2667_v18 = vpop.f32.mrf.mxu1 }
 0x1bf   : > { %v2668_v21 = vadd.f32 %v2667_v18, %v2122_v16 }
 0x1c0   : > { %v2124_v22 = vpop.f32.mrf.mxu0  ;;  %v2669_v24 = vpop.f32.mrf.mxu1 }
 0x1c1   : > { %3092 = vst [vmem:[%s4490_s17 + $0xe8] sm:$0xff] %v2668_v21 }
 0x1c2   : > { %v2127_v25 = vpop.f32.mrf.mxu0  ;;  %2318 = vmatmul.mubr.bf16.gmra.mxu0 %v3926_v17  ;;  %v2672_v26 = vpop.f32.mrf.mxu1  ;;  %2863 = vmatmul.mubr.bf16.gmra.mxu1 %v3929_v19 }
 0x1c3   : > { %2325 = vmatprep.mubr.bf16.mxu0 %v3934_v20  ;;  %v2673_v27 = vadd.f32 %v2672_v26, %v2127_v25  ;;  %2870 = vmatprep.mubr.bf16.mxu1 %v3937_v23  ;;  %v3956_v23 = vld [vmem:[%s4345_s24 + $0x580] ss:$16 sps:$4 sm:$0xff]   ;;  %v3959_v25 = vld [vmem:[%s4345_s24 + $0x588] ss:$16 sps:$4 sm:$0xff]   ;;  %v3964_v26 = vld [vmem:[%s4345_s24 + $0x5a4] ss:$16 sps:$4 sm:$0xff]  }
 0x1c4   : > { %v2129_v28 = vpop.f32.mrf.mxu0  ;;  %v2674_v29 = vpop.f32.mrf.mxu1 }
 0x1c5   : > { %3093 = vst [vmem:[%s4490_s17 + $0xf0] sm:$0xff] %v2673_v27  ;;  %v3967_v29 = vld [vmem:[%s4345_s24 + $0x5ac] ss:$16 sps:$4 sm:$0xff]  }
 0x1c6   : > { %v2130_v30 = vpop.f32.mrf.mxu0  ;;  %v2675_v32 = vpop.f32.mrf.mxu1 }
 0x1c7   : > { %v2676_v35 = vadd.f32 %v2675_v32, %v2130_v30 }
 0x1c8   : > { %v2132_v36 = vpop.f32.mrf.mxu0  ;;  %v2677_v38 = vpop.f32.mrf.mxu1 }
 0x1c9   : > { %3094 = vst [vmem:[%s4490_s17 + $0xf8] sm:$0xff] %v2676_v35 }
 0x1ca   : > { %v2135_v39 = vpop.f32.mrf.mxu0  ;;  %2326 = vmatmul.mubr.bf16.gmra.mxu0 %v3932_v31  ;;  %v2680_v40 = vpop.f32.mrf.mxu1  ;;  %2871 = vmatmul.mubr.bf16.gmra.mxu1 %v3935_v33 }
 0x1cb   : > { %2333 = vmatprep.mubr.bf16.mxu0 %v3940_v34  ;;  %v2681_v41 = vadd.f32 %v2680_v40, %v2135_v39  ;;  %2878 = vmatprep.mubr.bf16.mxu1 %v3943_v37  ;;  %v3962_v37 = vld [vmem:[%s4345_s24 + $0x5a0] ss:$16 sps:$4 sm:$0xff]   ;;  %v3965_v39 = vld [vmem:[%s4345_s24 + $0x5a8] ss:$16 sps:$4 sm:$0xff]   ;;  %v3970_v40 = vld [vmem:[%s4345_s24 + $0x5c4] ss:$16 sps:$4 sm:$0xff]  }
 0x1cc   : > { %v2137_v42 = vpop.f32.mrf.mxu0  ;;  %v2682_v43 = vpop.f32.mrf.mxu1 }
 0x1cd   : > { %3095 = vst [vmem:[%s4490_s17 + $0x100] sm:$0xff] %v2681_v41  ;;  %v3973_v43 = vld [vmem:[%s4345_s24 + $0x5cc] ss:$16 sps:$4 sm:$0xff]  }
 0x1ce   : > { %v2138_v44 = vpop.f32.mrf.mxu0  ;;  %v2683_v46 = vpop.f32.mrf.mxu1 }
 0x1cf   : > { %v2684_v49 = vadd.f32 %v2683_v46, %v2138_v44 }
 0x1d0   : > { %v2140_v50 = vpop.f32.mrf.mxu0  ;;  %v2685_v52 = vpop.f32.mrf.mxu1 }
 0x1d1   : > { %3096 = vst [vmem:[%s4490_s17 + $0x108] sm:$0xff] %v2684_v49 }
 0x1d2   : > { %v2143_v53 = vpop.f32.mrf.mxu0  ;;  %2334 = vmatmul.mubr.bf16.gmra.mxu0 %v3938_v45  ;;  %v2688_v54 = vpop.f32.mrf.mxu1  ;;  %2879 = vmatmul.mubr.bf16.gmra.mxu1 %v3941_v47 }
 0x1d3   : > { %2341 = vmatprep.mubr.bf16.mxu0 %v3946_v48  ;;  %v2689_v55 = vadd.f32 %v2688_v54, %v2143_v53  ;;  %2886 = vmatprep.mubr.bf16.mxu1 %v3949_v51  ;;  %v3968_v51 = vld [vmem:[%s4345_s24 + $0x5c0] ss:$16 sps:$4 sm:$0xff]   ;;  %v3971_v53 = vld [vmem:[%s4345_s24 + $0x5c8] ss:$16 sps:$4 sm:$0xff]   ;;  %v3976_v54 = vld [vmem:[%s4345_s24 + $0x5e4] ss:$16 sps:$4 sm:$0xff]  }
 0x1d4   : > { %v2145_v56 = vpop.f32.mrf.mxu0  ;;  %v2690_v57 = vpop.f32.mrf.mxu1 }
 0x1d5   : > { %3097 = vst [vmem:[%s4490_s17 + $0x110] sm:$0xff] %v2689_v55  ;;  %v3979_v57 = vld [vmem:[%s4345_s24 + $0x5ec] ss:$16 sps:$4 sm:$0xff]  }
 0x1d6   : > { %v2146_v58 = vpop.f32.mrf.mxu0  ;;  %v2691_v60 = vpop.f32.mrf.mxu1 }
 0x1d7   : > { %v2692_v63 = vadd.f32 %v2691_v60, %v2146_v58 }
 0x1d8   : > { %v2148_v0 = vpop.f32.mrf.mxu0  ;;  %v2693_v2 = vpop.f32.mrf.mxu1 }
 0x1d9   : > { %3098 = vst [vmem:[%s4490_s17 + $0x118] sm:$0xff] %v2692_v63 }
 0x1da   : > { %v2151_v3 = vpop.f32.mrf.mxu0  ;;  %2342 = vmatmul.mubr.bf16.gmra.mxu0 %v3944_v59  ;;  %v2696_v4 = vpop.f32.mrf.mxu1  ;;  %2887 = vmatmul.mubr.bf16.gmra.mxu1 %v3947_v61 }
 0x1db   : > { %2349 = vmatprep.mubr.bf16.mxu0 %v3952_v62  ;;  %v2697_v5 = vadd.f32 %v2696_v4, %v2151_v3  ;;  %2894 = vmatprep.mubr.bf16.mxu1 %v3955_v1  ;;  %v3974_v1 = vld [vmem:[%s4345_s24 + $0x5e0] ss:$16 sps:$4 sm:$0xff]   ;;  %v3977_v3 = vld [vmem:[%s4345_s24 + $0x5e8] ss:$16 sps:$4 sm:$0xff]   ;;  %v3982_v4 = vld [vmem:[%s4345_s24 + $0x604] ss:$16 sps:$4 sm:$0xff]  }
 0x1dc   : > { %v2153_v6 = vpop.f32.mrf.mxu0  ;;  %v2698_v7 = vpop.f32.mrf.mxu1 }
 0x1dd   : > { %3099 = vst [vmem:[%s4490_s17 + $0x120] sm:$0xff] %v2697_v5  ;;  %v3985_v7 = vld [vmem:[%s4345_s24 + $0x60c] ss:$16 sps:$4 sm:$0xff]  }
 0x1de   : > { %v2154_v8 = vpop.f32.mrf.mxu0  ;;  %v2699_v10 = vpop.f32.mrf.mxu1 }
 0x1df   : > { %v2700_v13 = vadd.f32 %v2699_v10, %v2154_v8 }
 0x1e0   : > { %v2156_v14 = vpop.f32.mrf.mxu0  ;;  %v2701_v16 = vpop.f32.mrf.mxu1 }
 0x1e1   : > { %3100 = vst [vmem:[%s4490_s17 + $0x128] sm:$0xff] %v2700_v13 }
 0x1e2   : > { %v2159_v17 = vpop.f32.mrf.mxu0  ;;  %2350 = vmatmul.mubr.bf16.gmra.mxu0 %v3950_v9  ;;  %v2704_v18 = vpop.f32.mrf.mxu1  ;;  %2895 = vmatmul.mubr.bf16.gmra.mxu1 %v3953_v11 }
 0x1e3   : > { %2357 = vmatprep.mubr.bf16.mxu0 %v3958_v12  ;;  %v2705_v19 = vadd.f32 %v2704_v18, %v2159_v17  ;;  %2902 = vmatprep.mubr.bf16.mxu1 %v3961_v15  ;;  %v3980_v15 = vld [vmem:[%s4345_s24 + $0x600] ss:$16 sps:$4 sm:$0xff]   ;;  %v3983_v17 = vld [vmem:[%s4345_s24 + $0x608] ss:$16 sps:$4 sm:$0xff]   ;;  %v3988_v18 = vld [vmem:[%s4345_s24 + $0x624] ss:$16 sps:$4 sm:$0xff]  }
 0x1e4   : > { %v2161_v20 = vpop.f32.mrf.mxu0  ;;  %v2706_v21 = vpop.f32.mrf.mxu1 }
 0x1e5   : > { %3101 = vst [vmem:[%s4490_s17 + $0x130] sm:$0xff] %v2705_v19  ;;  %v3991_v21 = vld [vmem:[%s4345_s24 + $0x62c] ss:$16 sps:$4 sm:$0xff]  }
 0x1e6   : > { %v2162_v22 = vpop.f32.mrf.mxu0  ;;  %v2707_v24 = vpop.f32.mrf.mxu1 }
 0x1e7   : > { %v2708_v27 = vadd.f32 %v2707_v24, %v2162_v22 }
 0x1e8   : > { %v2164_v28 = vpop.f32.mrf.mxu0  ;;  %v2709_v30 = vpop.f32.mrf.mxu1 }
 0x1e9   : > { %3102 = vst [vmem:[%s4490_s17 + $0x138] sm:$0xff] %v2708_v27 }
 0x1ea   : > { %v2167_v31 = vpop.f32.mrf.mxu0  ;;  %2358 = vmatmul.mubr.bf16.gmra.mxu0 %v3956_v23  ;;  %v2712_v32 = vpop.f32.mrf.mxu1  ;;  %2903 = vmatmul.mubr.bf16.gmra.mxu1 %v3959_v25 }
 0x1eb   : > { %2365 = vmatprep.mubr.bf16.mxu0 %v3964_v26  ;;  %v2713_v33 = vadd.f32 %v2712_v32, %v2167_v31  ;;  %2910 = vmatprep.mubr.bf16.mxu1 %v3967_v29  ;;  %v3986_v29 = vld [vmem:[%s4345_s24 + $0x620] ss:$16 sps:$4 sm:$0xff]   ;;  %v3989_v31 = vld [vmem:[%s4345_s24 + $0x628] ss:$16 sps:$4 sm:$0xff]   ;;  %v3994_v32 = vld [vmem:[%s4345_s24 + $0x644] ss:$16 sps:$4 sm:$0xff]  }
 0x1ec   : > { %v2169_v34 = vpop.f32.mrf.mxu0  ;;  %v2714_v35 = vpop.f32.mrf.mxu1 }
 0x1ed   : > { %3103 = vst [vmem:[%s4490_s17 + $0x140] sm:$0xff] %v2713_v33  ;;  %v3997_v35 = vld [vmem:[%s4345_s24 + $0x64c] ss:$16 sps:$4 sm:$0xff]  }
 0x1ee   : > { %v2170_v36 = vpop.f32.mrf.mxu0  ;;  %v2715_v38 = vpop.f32.mrf.mxu1 }
 0x1ef   : > { %v2716_v41 = vadd.f32 %v2715_v38, %v2170_v36 }
 0x1f0   : > { %v2172_v42 = vpop.f32.mrf.mxu0  ;;  %v2717_v44 = vpop.f32.mrf.mxu1 }
 0x1f1   : > { %3104 = vst [vmem:[%s4490_s17 + $0x148] sm:$0xff] %v2716_v41 }
 0x1f2   : > { %v2175_v45 = vpop.f32.mrf.mxu0  ;;  %2366 = vmatmul.mubr.bf16.gmra.mxu0 %v3962_v37  ;;  %v2720_v46 = vpop.f32.mrf.mxu1  ;;  %2911 = vmatmul.mubr.bf16.gmra.mxu1 %v3965_v39 }
 0x1f3   : > { %2373 = vmatprep.mubr.bf16.mxu0 %v3970_v40  ;;  %v2721_v47 = vadd.f32 %v2720_v46, %v2175_v45  ;;  %2918 = vmatprep.mubr.bf16.mxu1 %v3973_v43  ;;  %v3992_v43 = vld [vmem:[%s4345_s24 + $0x640] ss:$16 sps:$4 sm:$0xff]   ;;  %v3995_v45 = vld [vmem:[%s4345_s24 + $0x648] ss:$16 sps:$4 sm:$0xff]   ;;  %v4000_v46 = vld [vmem:[%s4345_s24 + $0x664] ss:$16 sps:$4 sm:$0xff]  }
 0x1f4   : > { %v2177_v48 = vpop.f32.mrf.mxu0  ;;  %v2722_v49 = vpop.f32.mrf.mxu1 }
 0x1f5   : > { %3105 = vst [vmem:[%s4490_s17 + $0x150] sm:$0xff] %v2721_v47  ;;  %v4003_v49 = vld [vmem:[%s4345_s24 + $0x66c] ss:$16 sps:$4 sm:$0xff]  }
 0x1f6   : > { %v2178_v50 = vpop.f32.mrf.mxu0  ;;  %v2723_v52 = vpop.f32.mrf.mxu1 }
 0x1f7   : > { %v2724_v55 = vadd.f32 %v2723_v52, %v2178_v50 }
 0x1f8   : > { %v2180_v56 = vpop.f32.mrf.mxu0  ;;  %v2725_v58 = vpop.f32.mrf.mxu1 }
 0x1f9   : > { %3106 = vst [vmem:[%s4490_s17 + $0x158] sm:$0xff] %v2724_v55 }
 0x1fa   : > { %v2183_v59 = vpop.f32.mrf.mxu0  ;;  %2374 = vmatmul.mubr.bf16.gmra.mxu0 %v3968_v51  ;;  %v2728_v60 = vpop.f32.mrf.mxu1  ;;  %2919 = vmatmul.mubr.bf16.gmra.mxu1 %v3971_v53 }
 0x1fb   : > { %2381 = vmatprep.mubr.bf16.mxu0 %v3976_v54  ;;  %v2729_v61 = vadd.f32 %v2728_v60, %v2183_v59  ;;  %2926 = vmatprep.mubr.bf16.mxu1 %v3979_v57  ;;  %v3998_v57 = vld [vmem:[%s4345_s24 + $0x660] ss:$16 sps:$4 sm:$0xff]   ;;  %v4001_v59 = vld [vmem:[%s4345_s24 + $0x668] ss:$16 sps:$4 sm:$0xff]   ;;  %v4006_v60 = vld [vmem:[%s4345_s24 + $0x684] ss:$16 sps:$4 sm:$0xff]  }
 0x1fc   : > { %v2185_v62 = vpop.f32.mrf.mxu0  ;;  %v2730_v63 = vpop.f32.mrf.mxu1 }
 0x1fd   : > { %3107 = vst [vmem:[%s4490_s17 + $0x160] sm:$0xff] %v2729_v61  ;;  %v4009_v63 = vld [vmem:[%s4345_s24 + $0x68c] ss:$16 sps:$4 sm:$0xff]  }
 0x1fe   : > { %v2186_v0 = vpop.f32.mrf.mxu0  ;;  %v2731_v2 = vpop.f32.mrf.mxu1 }
 0x1ff   : > { %v2732_v5 = vadd.f32 %v2731_v2, %v2186_v0 }
 0x200   : > { %v2188_v6 = vpop.f32.mrf.mxu0  ;;  %v2733_v8 = vpop.f32.mrf.mxu1 }
 0x201   : > { %3108 = vst [vmem:[%s4490_s17 + $0x168] sm:$0xff] %v2732_v5 }
 0x202   : > { %v2191_v9 = vpop.f32.mrf.mxu0  ;;  %2382 = vmatmul.mubr.bf16.gmra.mxu0 %v3974_v1  ;;  %v2736_v10 = vpop.f32.mrf.mxu1  ;;  %2927 = vmatmul.mubr.bf16.gmra.mxu1 %v3977_v3 }
 0x203   : > { %2389 = vmatprep.mubr.bf16.mxu0 %v3982_v4  ;;  %v2737_v11 = vadd.f32 %v2736_v10, %v2191_v9  ;;  %2934 = vmatprep.mubr.bf16.mxu1 %v3985_v7  ;;  %v4004_v7 = vld [vmem:[%s4345_s24 + $0x680] ss:$16 sps:$4 sm:$0xff]   ;;  %v4007_v9 = vld [vmem:[%s4345_s24 + $0x688] ss:$16 sps:$4 sm:$0xff]   ;;  %v4012_v10 = vld [vmem:[%s4345_s24 + $0x6a4] ss:$16 sps:$4 sm:$0xff]  }
 0x204   : > { %v2193_v12 = vpop.f32.mrf.mxu0  ;;  %v2738_v13 = vpop.f32.mrf.mxu1 }
 0x205   : > { %3109 = vst [vmem:[%s4490_s17 + $0x170] sm:$0xff] %v2737_v11  ;;  %v4015_v13 = vld [vmem:[%s4345_s24 + $0x6ac] ss:$16 sps:$4 sm:$0xff]  }
 0x206   : > { %v2194_v14 = vpop.f32.mrf.mxu0  ;;  %v2739_v16 = vpop.f32.mrf.mxu1 }
 0x207   : > { %v2740_v19 = vadd.f32 %v2739_v16, %v2194_v14 }
 0x208   : > { %v2196_v20 = vpop.f32.mrf.mxu0  ;;  %v2741_v22 = vpop.f32.mrf.mxu1 }
 0x209   : > { %3110 = vst [vmem:[%s4490_s17 + $0x178] sm:$0xff] %v2740_v19 }
 0x20a   : > { %v2199_v23 = vpop.f32.mrf.mxu0  ;;  %2390 = vmatmul.mubr.bf16.gmra.mxu0 %v3980_v15  ;;  %v2744_v24 = vpop.f32.mrf.mxu1  ;;  %2935 = vmatmul.mubr.bf16.gmra.mxu1 %v3983_v17 }
 0x20b   : > { %2397 = vmatprep.mubr.bf16.mxu0 %v3988_v18  ;;  %v2745_v25 = vadd.f32 %v2744_v24, %v2199_v23  ;;  %2942 = vmatprep.mubr.bf16.mxu1 %v3991_v21  ;;  %v4010_v21 = vld [vmem:[%s4345_s24 + $0x6a0] ss:$16 sps:$4 sm:$0xff]   ;;  %v4013_v23 = vld [vmem:[%s4345_s24 + $0x6a8] ss:$16 sps:$4 sm:$0xff]   ;;  %v4018_v24 = vld [vmem:[%s4345_s24 + $0x6c4] ss:$16 sps:$4 sm:$0xff]  }
 0x20c   : > { %v2201_v26 = vpop.f32.mrf.mxu0  ;;  %v2746_v27 = vpop.f32.mrf.mxu1 }
 0x20d   : > { %3111 = vst [vmem:[%s4490_s17 + $0x180] sm:$0xff] %v2745_v25  ;;  %v4021_v27 = vld [vmem:[%s4345_s24 + $0x6cc] ss:$16 sps:$4 sm:$0xff]  }
 0x20e   : > { %v2202_v28 = vpop.f32.mrf.mxu0  ;;  %v2747_v30 = vpop.f32.mrf.mxu1 }
 0x20f   : > { %v2748_v33 = vadd.f32 %v2747_v30, %v2202_v28 }
 0x210   : > { %v2204_v34 = vpop.f32.mrf.mxu0  ;;  %v2749_v36 = vpop.f32.mrf.mxu1 }
 0x211   : > { %3112 = vst [vmem:[%s4490_s17 + $0x188] sm:$0xff] %v2748_v33 }
 0x212   : > { %v2207_v37 = vpop.f32.mrf.mxu0  ;;  %2398 = vmatmul.mubr.bf16.gmra.mxu0 %v3986_v29  ;;  %v2752_v38 = vpop.f32.mrf.mxu1  ;;  %2943 = vmatmul.mubr.bf16.gmra.mxu1 %v3989_v31 }
 0x213   : > { %2405 = vmatprep.mubr.bf16.mxu0 %v3994_v32  ;;  %v2753_v39 = vadd.f32 %v2752_v38, %v2207_v37  ;;  %2950 = vmatprep.mubr.bf16.mxu1 %v3997_v35  ;;  %v4016_v35 = vld [vmem:[%s4345_s24 + $0x6c0] ss:$16 sps:$4 sm:$0xff]   ;;  %v4019_v37 = vld [vmem:[%s4345_s24 + $0x6c8] ss:$16 sps:$4 sm:$0xff]   ;;  %v4024_v38 = vld [vmem:[%s4345_s24 + $0x6e4] ss:$16 sps:$4 sm:$0xff]  }
 0x214   : > { %v2209_v40 = vpop.f32.mrf.mxu0  ;;  %v2754_v41 = vpop.f32.mrf.mxu1 }
 0x215   : > { %3113 = vst [vmem:[%s4490_s17 + $0x190] sm:$0xff] %v2753_v39  ;;  %v4027_v41 = vld [vmem:[%s4345_s24 + $0x6ec] ss:$16 sps:$4 sm:$0xff]  }
 0x216   : > { %v2210_v42 = vpop.f32.mrf.mxu0  ;;  %v2755_v44 = vpop.f32.mrf.mxu1 }
 0x217   : > { %v2756_v47 = vadd.f32 %v2755_v44, %v2210_v42 }
 0x218   : > { %v2212_v48 = vpop.f32.mrf.mxu0  ;;  %v2757_v50 = vpop.f32.mrf.mxu1 }
 0x219   : > { %3114 = vst [vmem:[%s4490_s17 + $0x198] sm:$0xff] %v2756_v47 }
 0x21a   : > { %v2215_v51 = vpop.f32.mrf.mxu0  ;;  %2406 = vmatmul.mubr.bf16.gmra.mxu0 %v3992_v43  ;;  %v2760_v52 = vpop.f32.mrf.mxu1  ;;  %2951 = vmatmul.mubr.bf16.gmra.mxu1 %v3995_v45 }
 0x21b   : > { %2413 = vmatprep.mubr.bf16.mxu0 %v4000_v46  ;;  %v2761_v53 = vadd.f32 %v2760_v52, %v2215_v51  ;;  %2958 = vmatprep.mubr.bf16.mxu1 %v4003_v49  ;;  %v4022_v49 = vld [vmem:[%s4345_s24 + $0x6e0] ss:$16 sps:$4 sm:$0xff]   ;;  %v4025_v51 = vld [vmem:[%s4345_s24 + $0x6e8] ss:$16 sps:$4 sm:$0xff]   ;;  %v4030_v52 = vld [vmem:[%s4345_s24 + $0x704] ss:$16 sps:$4 sm:$0xff]  }
 0x21c   : > { %v2217_v54 = vpop.f32.mrf.mxu0  ;;  %v2762_v55 = vpop.f32.mrf.mxu1 }
 0x21d   : > { %3115 = vst [vmem:[%s4490_s17 + $0x1a0] sm:$0xff] %v2761_v53  ;;  %v4033_v55 = vld [vmem:[%s4345_s24 + $0x70c] ss:$16 sps:$4 sm:$0xff]  }
 0x21e   : > { %v2218_v56 = vpop.f32.mrf.mxu0  ;;  %v2763_v58 = vpop.f32.mrf.mxu1 }
 0x21f   : > { %v2764_v61 = vadd.f32 %v2763_v58, %v2218_v56 }
 0x220   : > { %v2220_v62 = vpop.f32.mrf.mxu0  ;;  %v2765_v0 = vpop.f32.mrf.mxu1 }
 0x221   : > { %3116 = vst [vmem:[%s4490_s17 + $0x1a8] sm:$0xff] %v2764_v61 }
 0x222   : > { %v2223_v1 = vpop.f32.mrf.mxu0  ;;  %2414 = vmatmul.mubr.bf16.gmra.mxu0 %v3998_v57  ;;  %v2768_v2 = vpop.f32.mrf.mxu1  ;;  %2959 = vmatmul.mubr.bf16.gmra.mxu1 %v4001_v59 }
 0x223   : > { %2421 = vmatprep.mubr.bf16.mxu0 %v4006_v60  ;;  %v2769_v3 = vadd.f32 %v2768_v2, %v2223_v1  ;;  %2966 = vmatprep.mubr.bf16.mxu1 %v4009_v63  ;;  %v4028_v63 = vld [vmem:[%s4345_s24 + $0x700] ss:$16 sps:$4 sm:$0xff]   ;;  %v4031_v1 = vld [vmem:[%s4345_s24 + $0x708] ss:$16 sps:$4 sm:$0xff]   ;;  %v4036_v2 = vld [vmem:[%s4345_s24 + $0x724] ss:$16 sps:$4 sm:$0xff]  }
 0x224   : > { %v2225_v4 = vpop.f32.mrf.mxu0  ;;  %v2770_v5 = vpop.f32.mrf.mxu1 }
 0x225   : > { %3117 = vst [vmem:[%s4490_s17 + $0x1b0] sm:$0xff] %v2769_v3  ;;  %v4039_v5 = vld [vmem:[%s4345_s24 + $0x72c] ss:$16 sps:$4 sm:$0xff]  }
 0x226   : > { %v2226_v6 = vpop.f32.mrf.mxu0  ;;  %v2771_v8 = vpop.f32.mrf.mxu1 }
 0x227   : > { %v2772_v11 = vadd.f32 %v2771_v8, %v2226_v6 }
 0x228   : > { %v2228_v12 = vpop.f32.mrf.mxu0  ;;  %v2773_v14 = vpop.f32.mrf.mxu1 }
 0x229   : > { %3118 = vst [vmem:[%s4490_s17 + $0x1b8] sm:$0xff] %v2772_v11 }
 0x22a   : > { %v2231_v15 = vpop.f32.mrf.mxu0  ;;  %2422 = vmatmul.mubr.bf16.gmra.mxu0 %v4004_v7  ;;  %v2776_v16 = vpop.f32.mrf.mxu1  ;;  %2967 = vmatmul.mubr.bf16.gmra.mxu1 %v4007_v9 }
 0x22b   : > { %2429 = vmatprep.mubr.bf16.mxu0 %v4012_v10  ;;  %v2777_v17 = vadd.f32 %v2776_v16, %v2231_v15  ;;  %2974 = vmatprep.mubr.bf16.mxu1 %v4015_v13  ;;  %v4034_v13 = vld [vmem:[%s4345_s24 + $0x720] ss:$16 sps:$4 sm:$0xff]   ;;  %v4037_v15 = vld [vmem:[%s4345_s24 + $0x728] ss:$16 sps:$4 sm:$0xff]   ;;  %v4042_v16 = vld [vmem:[%s4345_s24 + $0x744] ss:$16 sps:$4 sm:$0xff]  }
 0x22c   : > { %v2233_v18 = vpop.f32.mrf.mxu0  ;;  %v2778_v19 = vpop.f32.mrf.mxu1 }
 0x22d   : > { %3119 = vst [vmem:[%s4490_s17 + $0x1c0] sm:$0xff] %v2777_v17  ;;  %v4045_v19 = vld [vmem:[%s4345_s24 + $0x74c] ss:$16 sps:$4 sm:$0xff]  }
 0x22e   : > { %v2234_v20 = vpop.f32.mrf.mxu0  ;;  %v2779_v22 = vpop.f32.mrf.mxu1 }
 0x22f   : > { %v2780_v25 = vadd.f32 %v2779_v22, %v2234_v20 }
 0x230   : > { %v2236_v26 = vpop.f32.mrf.mxu0  ;;  %v2781_v28 = vpop.f32.mrf.mxu1 }
 0x231   : > { %3120 = vst [vmem:[%s4490_s17 + $0x1c8] sm:$0xff] %v2780_v25 }
 0x232   : > { %v2239_v29 = vpop.f32.mrf.mxu0  ;;  %2430 = vmatmul.mubr.bf16.gmra.mxu0 %v4010_v21  ;;  %v2784_v30 = vpop.f32.mrf.mxu1  ;;  %2975 = vmatmul.mubr.bf16.gmra.mxu1 %v4013_v23 }
 0x233   : > { %2437 = vmatprep.mubr.bf16.mxu0 %v4018_v24  ;;  %v2785_v31 = vadd.f32 %v2784_v30, %v2239_v29  ;;  %2982 = vmatprep.mubr.bf16.mxu1 %v4021_v27  ;;  %v4040_v27 = vld [vmem:[%s4345_s24 + $0x740] ss:$16 sps:$4 sm:$0xff]   ;;  %v4043_v29 = vld [vmem:[%s4345_s24 + $0x748] ss:$16 sps:$4 sm:$0xff]   ;;  %v4048_v30 = vld [vmem:[%s4345_s24 + $0x764] ss:$16 sps:$4 sm:$0xff]  }
 0x234   : > { %v2241_v32 = vpop.f32.mrf.mxu0  ;;  %v2786_v33 = vpop.f32.mrf.mxu1 }
 0x235   : > { %3121 = vst [vmem:[%s4490_s17 + $0x1d0] sm:$0xff] %v2785_v31  ;;  %v4051_v33 = vld [vmem:[%s4345_s24 + $0x76c] ss:$16 sps:$4 sm:$0xff]  }
 0x236   : > { %v2242_v34 = vpop.f32.mrf.mxu0  ;;  %v2787_v36 = vpop.f32.mrf.mxu1 }
 0x237   : > { %v2788_v39 = vadd.f32 %v2787_v36, %v2242_v34 }
 0x238   : > { %v2244_v40 = vpop.f32.mrf.mxu0  ;;  %v2789_v42 = vpop.f32.mrf.mxu1 }
 0x239   : > { %3122 = vst [vmem:[%s4490_s17 + $0x1d8] sm:$0xff] %v2788_v39 }
 0x23a   : > { %v2247_v43 = vpop.f32.mrf.mxu0  ;;  %2438 = vmatmul.mubr.bf16.gmra.mxu0 %v4016_v35  ;;  %v2792_v44 = vpop.f32.mrf.mxu1  ;;  %2983 = vmatmul.mubr.bf16.gmra.mxu1 %v4019_v37 }
 0x23b   : > { %2445 = vmatprep.mubr.bf16.mxu0 %v4024_v38  ;;  %v2793_v45 = vadd.f32 %v2792_v44, %v2247_v43  ;;  %2990 = vmatprep.mubr.bf16.mxu1 %v4027_v41  ;;  %v4046_v41 = vld [vmem:[%s4345_s24 + $0x760] ss:$16 sps:$4 sm:$0xff]   ;;  %v4049_v43 = vld [vmem:[%s4345_s24 + $0x768] ss:$16 sps:$4 sm:$0xff]   ;;  %v4054_v44 = vld [vmem:[%s4345_s24 + $0x784] ss:$16 sps:$4 sm:$0xff]  }
 0x23c   : > { %v2249_v46 = vpop.f32.mrf.mxu0  ;;  %v2794_v47 = vpop.f32.mrf.mxu1 }
 0x23d   : > { %3123 = vst [vmem:[%s4490_s17 + $0x1e0] sm:$0xff] %v2793_v45  ;;  %v4057_v47 = vld [vmem:[%s4345_s24 + $0x78c] ss:$16 sps:$4 sm:$0xff]  }
 0x23e   : > { %v2250_v48 = vpop.f32.mrf.mxu0  ;;  %v2795_v50 = vpop.f32.mrf.mxu1 }
 0x23f   : > { %v2796_v53 = vadd.f32 %v2795_v50, %v2250_v48 }
 0x240   : > { %v2252_v54 = vpop.f32.mrf.mxu0  ;;  %v2797_v56 = vpop.f32.mrf.mxu1 }
 0x241   : > { %3124 = vst [vmem:[%s4490_s17 + $0x1e8] sm:$0xff] %v2796_v53 }
 0x242   : > { %v2255_v57 = vpop.f32.mrf.mxu0  ;;  %2446 = vmatmul.mubr.bf16.gmra.mxu0 %v4022_v49  ;;  %v2800_v58 = vpop.f32.mrf.mxu1  ;;  %2991 = vmatmul.mubr.bf16.gmra.mxu1 %v4025_v51 }
 0x243   : > { %2453 = vmatprep.mubr.bf16.mxu0 %v4030_v52  ;;  %v2801_v59 = vadd.f32 %v2800_v58, %v2255_v57  ;;  %2998 = vmatprep.mubr.bf16.mxu1 %v4033_v55  ;;  %v4052_v55 = vld [vmem:[%s4345_s24 + $0x780] ss:$16 sps:$4 sm:$0xff]   ;;  %v4055_v57 = vld [vmem:[%s4345_s24 + $0x788] ss:$16 sps:$4 sm:$0xff]   ;;  %v4060_v58 = vld [vmem:[%s4345_s24 + $0x7a4] ss:$16 sps:$4 sm:$0xff]  }
 0x244   : > { %v2257_v60 = vpop.f32.mrf.mxu0  ;;  %v2802_v61 = vpop.f32.mrf.mxu1 }
 0x245   : > { %3125 = vst [vmem:[%s4490_s17 + $0x1f0] sm:$0xff] %v2801_v59  ;;  %v4063_v61 = vld [vmem:[%s4345_s24 + $0x7ac] ss:$16 sps:$4 sm:$0xff]  }
 0x246   : > { %v2258_v62 = vpop.f32.mrf.mxu0  ;;  %v2803_v0 = vpop.f32.mrf.mxu1 }
 0x247   : > { %v2804_v3 = vadd.f32 %v2803_v0, %v2258_v62 }
 0x248   : > { %v2260_v4 = vpop.f32.mrf.mxu0  ;;  %v2805_v6 = vpop.f32.mrf.mxu1 }
 0x249   : > { %3126 = vst [vmem:[%s4490_s17 + $0x1f8] sm:$0xff] %v2804_v3 }
 0x24a   : > { %v2263_v7 = vpop.f32.mrf.mxu0  ;;  %2454 = vmatmul.mubr.bf16.gmra.mxu0 %v4028_v63  ;;  %v2808_v8 = vpop.f32.mrf.mxu1  ;;  %2999 = vmatmul.mubr.bf16.gmra.mxu1 %v4031_v1 }
 0x24b   : > { %2461 = vmatprep.mubr.bf16.mxu0 %v4036_v2  ;;  %v2809_v9 = vadd.f32 %v2808_v8, %v2263_v7  ;;  %3006 = vmatprep.mubr.bf16.mxu1 %v4039_v5  ;;  %v4058_v5 = vld [vmem:[%s4345_s24 + $0x7a0] ss:$16 sps:$4 sm:$0xff]   ;;  %v4061_v7 = vld [vmem:[%s4345_s24 + $0x7a8] ss:$16 sps:$4 sm:$0xff]   ;;  %v4066_v8 = vld [vmem:[%s4345_s24 + $0x7c4] ss:$16 sps:$4 sm:$0xff]  }
 0x24c   : > { %v2265_v10 = vpop.f32.mrf.mxu0  ;;  %v2810_v11 = vpop.f32.mrf.mxu1 }
 0x24d   : > { %3127 = vst [vmem:[%s4490_s17 + $0x200] sm:$0xff] %v2809_v9  ;;  %v4069_v11 = vld [vmem:[%s4345_s24 + $0x7cc] ss:$16 sps:$4 sm:$0xff]  }
 0x24e   : > { %v2266_v12 = vpop.f32.mrf.mxu0  ;;  %v2811_v14 = vpop.f32.mrf.mxu1 }
 0x24f   : > { %v2812_v17 = vadd.f32 %v2811_v14, %v2266_v12 }
 0x250   : > { %v2268_v18 = vpop.f32.mrf.mxu0  ;;  %v2813_v20 = vpop.f32.mrf.mxu1 }
 0x251   : > { %3128 = vst [vmem:[%s4490_s17 + $0x208] sm:$0xff] %v2812_v17 }
 0x252   : > { %v2271_v21 = vpop.f32.mrf.mxu0  ;;  %2462 = vmatmul.mubr.bf16.gmra.mxu0 %v4034_v13  ;;  %v2816_v22 = vpop.f32.mrf.mxu1  ;;  %3007 = vmatmul.mubr.bf16.gmra.mxu1 %v4037_v15 }
 0x253   : > { %2469 = vmatprep.mubr.bf16.mxu0 %v4042_v16  ;;  %v2817_v23 = vadd.f32 %v2816_v22, %v2271_v21  ;;  %3014 = vmatprep.mubr.bf16.mxu1 %v4045_v19  ;;  %v4064_v19 = vld [vmem:[%s4345_s24 + $0x7c0] ss:$16 sps:$4 sm:$0xff]   ;;  %v4067_v21 = vld [vmem:[%s4345_s24 + $0x7c8] ss:$16 sps:$4 sm:$0xff]   ;;  %v4072_v22 = vld [vmem:[%s4345_s24 + $0x7e4] ss:$16 sps:$4 sm:$0xff]  }
 0x254   : > { %v2273_v24 = vpop.f32.mrf.mxu0  ;;  %v2818_v25 = vpop.f32.mrf.mxu1 }
 0x255   : > { %3129 = vst [vmem:[%s4490_s17 + $0x210] sm:$0xff] %v2817_v23  ;;  %v4075_v25 = vld [vmem:[%s4345_s24 + $0x7ec] ss:$16 sps:$4 sm:$0xff]  }
 0x256   : > { %v2274_v26 = vpop.f32.mrf.mxu0  ;;  %v2819_v28 = vpop.f32.mrf.mxu1 }
 0x257   : > { %v2820_v31 = vadd.f32 %v2819_v28, %v2274_v26 }
 0x258   : > { %v2276_v32 = vpop.f32.mrf.mxu0  ;;  %v2821_v34 = vpop.f32.mrf.mxu1 }
 0x259   : > { %3130 = vst [vmem:[%s4490_s17 + $0x218] sm:$0xff] %v2820_v31 }
 0x25a   : > { %v2279_v35 = vpop.f32.mrf.mxu0  ;;  %2470 = vmatmul.mubr.bf16.gmra.mxu0 %v4040_v27  ;;  %v2824_v36 = vpop.f32.mrf.mxu1  ;;  %3015 = vmatmul.mubr.bf16.gmra.mxu1 %v4043_v29 }
 0x25b   : > { %2477 = vmatprep.mubr.bf16.mxu0 %v4048_v30  ;;  %v2825_v37 = vadd.f32 %v2824_v36, %v2279_v35  ;;  %3022 = vmatprep.mubr.bf16.mxu1 %v4051_v33  ;;  %v4070_v33 = vld [vmem:[%s4345_s24 + $0x7e0] ss:$16 sps:$4 sm:$0xff]   ;;  %v4073_v35 = vld [vmem:[%s4345_s24 + $0x7e8] ss:$16 sps:$4 sm:$0xff]  }
 0x25c   : > { %v2281_v38 = vpop.f32.mrf.mxu0  ;;  %v2826_v39 = vpop.f32.mrf.mxu1 }
 0x25d   : > { %3131 = vst [vmem:[%s4490_s17 + $0x220] sm:$0xff] %v2825_v37 }
 0x25e   : > { %v2282_v40 = vpop.f32.mrf.mxu0  ;;  %v2827_v42 = vpop.f32.mrf.mxu1 }
 0x25f   : > { %v2828_v45 = vadd.f32 %v2827_v42, %v2282_v40 }
 0x260   : > { %v2284_v46 = vpop.f32.mrf.mxu0  ;;  %v2829_v48 = vpop.f32.mrf.mxu1 }
 0x261   : > { %3132 = vst [vmem:[%s4490_s17 + $0x228] sm:$0xff] %v2828_v45 }
 0x262   : > { %v2287_v49 = vpop.f32.mrf.mxu0  ;;  %2478 = vmatmul.mubr.bf16.gmra.mxu0 %v4046_v41  ;;  %v2832_v50 = vpop.f32.mrf.mxu1  ;;  %3023 = vmatmul.mubr.bf16.gmra.mxu1 %v4049_v43 }
 0x263   : > { %2485 = vmatprep.mubr.bf16.mxu0 %v4054_v44  ;;  %v2833_v51 = vadd.f32 %v2832_v50, %v2287_v49  ;;  %3030 = vmatprep.mubr.bf16.mxu1 %v4057_v47 }
 0x264   : > { %v2289_v52 = vpop.f32.mrf.mxu0  ;;  %v2834_v53 = vpop.f32.mrf.mxu1 }
 0x265   : > { %3133 = vst [vmem:[%s4490_s17 + $0x230] sm:$0xff] %v2833_v51 }
 0x266   : > { %v2290_v54 = vpop.f32.mrf.mxu0  ;;  %v2835_v56 = vpop.f32.mrf.mxu1 }
 0x267   : > { %v2836_v59 = vadd.f32 %v2835_v56, %v2290_v54 }
 0x268   : > { %v2292_v60 = vpop.f32.mrf.mxu0  ;;  %v2837_v62 = vpop.f32.mrf.mxu1 }
 0x269   : > { %3134 = vst [vmem:[%s4490_s17 + $0x238] sm:$0xff] %v2836_v59 }
 0x26a   : > { %v2295_v63 = vpop.f32.mrf.mxu0  ;;  %2486 = vmatmul.mubr.bf16.gmra.mxu0 %v4052_v55  ;;  %v2840_v0 = vpop.f32.mrf.mxu1  ;;  %3031 = vmatmul.mubr.bf16.gmra.mxu1 %v4055_v57 }
 0x26b   : > { %2493 = vmatprep.mubr.bf16.mxu0 %v4060_v58  ;;  %v2841_v1 = vadd.f32 %v2840_v0, %v2295_v63  ;;  %3038 = vmatprep.mubr.bf16.mxu1 %v4063_v61 }
 0x26c   : > { %v2297_v2 = vpop.f32.mrf.mxu0  ;;  %v2842_v3 = vpop.f32.mrf.mxu1 }
 0x26d   : > { %3135 = vst [vmem:[%s4490_s17 + $0x240] sm:$0xff] %v2841_v1 }
 0x26e   : > { %v2298_v4 = vpop.f32.mrf.mxu0  ;;  %v2843_v6 = vpop.f32.mrf.mxu1 }
 0x26f   : > { %v2844_v9 = vadd.f32 %v2843_v6, %v2298_v4 }
 0x270   : > { %v2300_v10 = vpop.f32.mrf.mxu0  ;;  %v2845_v12 = vpop.f32.mrf.mxu1 }
 0x271   : > { %3136 = vst [vmem:[%s4490_s17 + $0x248] sm:$0xff] %v2844_v9 }
 0x272   : > { %v2303_v13 = vpop.f32.mrf.mxu0  ;;  %2494 = vmatmul.mubr.bf16.gmra.mxu0 %v4058_v5  ;;  %v2848_v14 = vpop.f32.mrf.mxu1  ;;  %3039 = vmatmul.mubr.bf16.gmra.mxu1 %v4061_v7 }
 0x273   : > { %2501 = vmatprep.mubr.bf16.mxu0 %v4066_v8  ;;  %v2849_v15 = vadd.f32 %v2848_v14, %v2303_v13  ;;  %3046 = vmatprep.mubr.bf16.mxu1 %v4069_v11 }
 0x274   : > { %v2305_v16 = vpop.f32.mrf.mxu0  ;;  %v2850_v17 = vpop.f32.mrf.mxu1 }
 0x275   : > { %3137 = vst [vmem:[%s4490_s17 + $0x250] sm:$0xff] %v2849_v15 }
 0x276   : > { %v2306_v18 = vpop.f32.mrf.mxu0  ;;  %v2851_v20 = vpop.f32.mrf.mxu1 }
 0x277   : > { %v2852_v23 = vadd.f32 %v2851_v20, %v2306_v18 }
 0x278   : > { %v2308_v24 = vpop.f32.mrf.mxu0  ;;  %v2853_v26 = vpop.f32.mrf.mxu1 }
 0x279   : > { %3138 = vst [vmem:[%s4490_s17 + $0x258] sm:$0xff] %v2852_v23 }
 0x27a   : > { %v2311_v27 = vpop.f32.mrf.mxu0  ;;  %2502 = vmatmul.mubr.bf16.gmra.mxu0 %v4064_v19  ;;  %v2856_v28 = vpop.f32.mrf.mxu1  ;;  %3047 = vmatmul.mubr.bf16.gmra.mxu1 %v4067_v21 }
 0x27b   : > { %2509 = vmatprep.mubr.bf16.mxu0 %v4072_v22  ;;  %v2857_v29 = vadd.f32 %v2856_v28, %v2311_v27  ;;  %3054 = vmatprep.mubr.bf16.mxu1 %v4075_v25 }
 0x27c   : > { %v2313_v30 = vpop.f32.mrf.mxu0  ;;  %v2858_v31 = vpop.f32.mrf.mxu1 }
 0x27d   : > { %3139 = vst [vmem:[%s4490_s17 + $0x260] sm:$0xff] %v2857_v29 }
 0x27e   : > { %v2314_v32 = vpop.f32.mrf.mxu0  ;;  %v2859_v34 = vpop.f32.mrf.mxu1 }
 0x27f   : > { %v2860_v36 = vadd.f32 %v2859_v34, %v2314_v32 }
 0x280   : > { %v2316_v37 = vpop.f32.mrf.mxu0  ;;  %v2861_v38 = vpop.f32.mrf.mxu1 }
 0x281   : > { %3140 = vst [vmem:[%s4490_s17 + $0x268] sm:$0xff] %v2860_v36 }
 0x282   : > { %v2319_v39 = vpop.f32.mrf.mxu0  ;;  %2510 = vmatmul.mubr.bf16.gmra.mxu0 %v4070_v33  ;;  %v2864_v40 = vpop.f32.mrf.mxu1  ;;  %3055 = vmatmul.mubr.bf16.gmra.mxu1 %v4073_v35 }
 0x283   : > { %v2865_v41 = vadd.f32 %v2864_v40, %v2319_v39 }
 0x284   : > { %v2321_v42 = vpop.f32.mrf.mxu0  ;;  %v2866_v43 = vpop.f32.mrf.mxu1 }
 0x285   : > { %3141 = vst [vmem:[%s4490_s17 + $0x270] sm:$0xff] %v2865_v41 }
 0x286   : > { %v2322_v44 = vpop.f32.mrf.mxu0  ;;  %v2867_v45 = vpop.f32.mrf.mxu1 }
 0x287   : > { %v2868_v46 = vadd.f32 %v2867_v45, %v2322_v44 }
 0x288   : > { %v2324_v47 = vpop.f32.mrf.mxu0  ;;  %v2869_v48 = vpop.f32.mrf.mxu1 }
 0x289   : > { %3142 = vst [vmem:[%s4490_s17 + $0x278] sm:$0xff] %v2868_v46 }
 0x28a   : > { %v2327_v49 = vpop.f32.mrf.mxu0  ;;  %v2872_v50 = vpop.f32.mrf.mxu1 }
 0x28b   : > { %v2873_v51 = vadd.f32 %v2872_v50, %v2327_v49 }
 0x28c   : > { %v2329_v52 = vpop.f32.mrf.mxu0  ;;  %v2874_v53 = vpop.f32.mrf.mxu1 }
 0x28d   : > { %3143 = vst [vmem:[%s4490_s17 + $0x280] sm:$0xff] %v2873_v51 }
 0x28e   : > { %v2330_v54 = vpop.f32.mrf.mxu0  ;;  %v2875_v55 = vpop.f32.mrf.mxu1 }
 0x28f   : > { %v2876_v56 = vadd.f32 %v2875_v55, %v2330_v54 }
 0x290   : > { %v2332_v57 = vpop.f32.mrf.mxu0  ;;  %v2877_v58 = vpop.f32.mrf.mxu1 }
 0x291   : > { %3144 = vst [vmem:[%s4490_s17 + $0x288] sm:$0xff] %v2876_v56 }
 0x292   : > { %v2335_v59 = vpop.f32.mrf.mxu0  ;;  %v2880_v60 = vpop.f32.mrf.mxu1 }
 0x293   : > { %v2881_v61 = vadd.f32 %v2880_v60, %v2335_v59 }
 0x294   : > { %v2337_v62 = vpop.f32.mrf.mxu0  ;;  %v2882_v63 = vpop.f32.mrf.mxu1 }
 0x295   : > { %3145 = vst [vmem:[%s4490_s17 + $0x290] sm:$0xff] %v2881_v61 }
 0x296   : > { %v2338_v0 = vpop.f32.mrf.mxu0  ;;  %v2883_v1 = vpop.f32.mrf.mxu1 }
 0x297   : > { %v2884_v2 = vadd.f32 %v2883_v1, %v2338_v0 }
 0x298   : > { %v2340_v3 = vpop.f32.mrf.mxu0  ;;  %v2885_v4 = vpop.f32.mrf.mxu1 }
 0x299   : > { %3146 = vst [vmem:[%s4490_s17 + $0x298] sm:$0xff] %v2884_v2 }
 0x29a   : > { %v2343_v5 = vpop.f32.mrf.mxu0  ;;  %v2888_v6 = vpop.f32.mrf.mxu1 }
 0x29b   : > { %v2889_v7 = vadd.f32 %v2888_v6, %v2343_v5 }
 0x29c   : > { %v2345_v8 = vpop.f32.mrf.mxu0  ;;  %v2890_v9 = vpop.f32.mrf.mxu1 }
 0x29d   : > { %3147 = vst [vmem:[%s4490_s17 + $0x2a0] sm:$0xff] %v2889_v7 }
 0x29e   : > { %v2346_v10 = vpop.f32.mrf.mxu0  ;;  %v2891_v11 = vpop.f32.mrf.mxu1 }
 0x29f   : > { %v2892_v12 = vadd.f32 %v2891_v11, %v2346_v10 }
 0x2a0   : > { %v2348_v13 = vpop.f32.mrf.mxu0  ;;  %v2893_v14 = vpop.f32.mrf.mxu1 }
 0x2a1   : > { %3148 = vst [vmem:[%s4490_s17 + $0x2a8] sm:$0xff] %v2892_v12 }
 0x2a2   : > { %v2351_v15 = vpop.f32.mrf.mxu0  ;;  %v2896_v16 = vpop.f32.mrf.mxu1 }
 0x2a3   : > { %v2897_v17 = vadd.f32 %v2896_v16, %v2351_v15 }
 0x2a4   : > { %v2353_v18 = vpop.f32.mrf.mxu0  ;;  %v2898_v19 = vpop.f32.mrf.mxu1 }
 0x2a5   : > { %3149 = vst [vmem:[%s4490_s17 + $0x2b0] sm:$0xff] %v2897_v17 }
 0x2a6   : > { %v2354_v20 = vpop.f32.mrf.mxu0  ;;  %v2899_v21 = vpop.f32.mrf.mxu1 }
 0x2a7   : > { %v2900_v22 = vadd.f32 %v2899_v21, %v2354_v20 }
 0x2a8   : > { %v2356_v23 = vpop.f32.mrf.mxu0  ;;  %v2901_v24 = vpop.f32.mrf.mxu1 }
 0x2a9   : > { %3150 = vst [vmem:[%s4490_s17 + $0x2b8] sm:$0xff] %v2900_v22 }
 0x2aa   : > { %v2359_v25 = vpop.f32.mrf.mxu0  ;;  %v2904_v26 = vpop.f32.mrf.mxu1 }
 0x2ab   : > { %v2905_v27 = vadd.f32 %v2904_v26, %v2359_v25 }
 0x2ac   : > { %v2361_v28 = vpop.f32.mrf.mxu0  ;;  %v2906_v29 = vpop.f32.mrf.mxu1 }
 0x2ad   : > { %3151 = vst [vmem:[%s4490_s17 + $0x2c0] sm:$0xff] %v2905_v27 }
 0x2ae   : > { %v2362_v30 = vpop.f32.mrf.mxu0  ;;  %v2907_v31 = vpop.f32.mrf.mxu1 }
 0x2af   : > { %v2908_v32 = vadd.f32 %v2907_v31, %v2362_v30 }
 0x2b0   : > { %v2364_v33 = vpop.f32.mrf.mxu0  ;;  %v2909_v34 = vpop.f32.mrf.mxu1 }
 0x2b1   : > { %3152 = vst [vmem:[%s4490_s17 + $0x2c8] sm:$0xff] %v2908_v32 }
 0x2b2   : > { %v2367_v35 = vpop.f32.mrf.mxu0  ;;  %v2912_v36 = vpop.f32.mrf.mxu1 }
 0x2b3   : > { %v2913_v37 = vadd.f32 %v2912_v36, %v2367_v35 }
 0x2b4   : > { %v2369_v38 = vpop.f32.mrf.mxu0  ;;  %v2914_v39 = vpop.f32.mrf.mxu1 }
 0x2b5   : > { %3153 = vst [vmem:[%s4490_s17 + $0x2d0] sm:$0xff] %v2913_v37 }
 0x2b6   : > { %v2370_v40 = vpop.f32.mrf.mxu0  ;;  %v2915_v41 = vpop.f32.mrf.mxu1 }
 0x2b7   : > { %v2916_v42 = vadd.f32 %v2915_v41, %v2370_v40 }
 0x2b8   : > { %v2372_v43 = vpop.f32.mrf.mxu0  ;;  %v2917_v44 = vpop.f32.mrf.mxu1 }
 0x2b9   : > { %3154 = vst [vmem:[%s4490_s17 + $0x2d8] sm:$0xff] %v2916_v42 }
 0x2ba   : > { %v2375_v45 = vpop.f32.mrf.mxu0  ;;  %v2920_v46 = vpop.f32.mrf.mxu1 }
 0x2bb   : > { %v2921_v47 = vadd.f32 %v2920_v46, %v2375_v45 }
 0x2bc   : > { %v2377_v48 = vpop.f32.mrf.mxu0  ;;  %v2922_v49 = vpop.f32.mrf.mxu1 }
 0x2bd   : > { %3155 = vst [vmem:[%s4490_s17 + $0x2e0] sm:$0xff] %v2921_v47 }
 0x2be   : > { %v2378_v50 = vpop.f32.mrf.mxu0  ;;  %v2923_v51 = vpop.f32.mrf.mxu1 }
 0x2bf   : > { %v2924_v52 = vadd.f32 %v2923_v51, %v2378_v50 }
 0x2c0   : > { %v2380_v53 = vpop.f32.mrf.mxu0  ;;  %v2925_v54 = vpop.f32.mrf.mxu1 }
 0x2c1   : > { %3156 = vst [vmem:[%s4490_s17 + $0x2e8] sm:$0xff] %v2924_v52 }
 0x2c2   : > { %v2383_v55 = vpop.f32.mrf.mxu0  ;;  %v2928_v56 = vpop.f32.mrf.mxu1 }
 0x2c3   : > { %v2929_v57 = vadd.f32 %v2928_v56, %v2383_v55 }
 0x2c4   : > { %v2385_v58 = vpop.f32.mrf.mxu0  ;;  %v2930_v59 = vpop.f32.mrf.mxu1 }
 0x2c5   : > { %3157 = vst [vmem:[%s4490_s17 + $0x2f0] sm:$0xff] %v2929_v57 }
 0x2c6   : > { %v2386_v60 = vpop.f32.mrf.mxu0  ;;  %v2931_v61 = vpop.f32.mrf.mxu1 }
 0x2c7   : > { %v2932_v62 = vadd.f32 %v2931_v61, %v2386_v60 }
 0x2c8   : > { %v2388_v63 = vpop.f32.mrf.mxu0  ;;  %v2933_v0 = vpop.f32.mrf.mxu1 }
 0x2c9   : > { %3158 = vst [vmem:[%s4490_s17 + $0x2f8] sm:$0xff] %v2932_v62 }
 0x2ca   : > { %v2391_v1 = vpop.f32.mrf.mxu0  ;;  %v2936_v2 = vpop.f32.mrf.mxu1 }
 0x2cb   : > { %v2937_v3 = vadd.f32 %v2936_v2, %v2391_v1 }
 0x2cc   : > { %v2393_v4 = vpop.f32.mrf.mxu0  ;;  %v2938_v5 = vpop.f32.mrf.mxu1 }
 0x2cd   : > { %3159 = vst [vmem:[%s4490_s17 + $0x300] sm:$0xff] %v2937_v3 }
 0x2ce   : > { %v2394_v6 = vpop.f32.mrf.mxu0  ;;  %v2939_v7 = vpop.f32.mrf.mxu1 }
 0x2cf   : > { %v2940_v8 = vadd.f32 %v2939_v7, %v2394_v6 }
 0x2d0   : > { %v2396_v9 = vpop.f32.mrf.mxu0  ;;  %v2941_v10 = vpop.f32.mrf.mxu1 }
 0x2d1   : > { %3160 = vst [vmem:[%s4490_s17 + $0x308] sm:$0xff] %v2940_v8 }
 0x2d2   : > { %v2399_v11 = vpop.f32.mrf.mxu0  ;;  %v2944_v12 = vpop.f32.mrf.mxu1 }
 0x2d3   : > { %v2945_v13 = vadd.f32 %v2944_v12, %v2399_v11 }
 0x2d4   : > { %v2401_v14 = vpop.f32.mrf.mxu0  ;;  %v2946_v15 = vpop.f32.mrf.mxu1 }
 0x2d5   : > { %3161 = vst [vmem:[%s4490_s17 + $0x310] sm:$0xff] %v2945_v13 }
 0x2d6   : > { %v2402_v16 = vpop.f32.mrf.mxu0  ;;  %v2947_v17 = vpop.f32.mrf.mxu1 }
 0x2d7   : > { %v2948_v18 = vadd.f32 %v2947_v17, %v2402_v16 }
 0x2d8   : > { %v2404_v19 = vpop.f32.mrf.mxu0  ;;  %v2949_v20 = vpop.f32.mrf.mxu1 }
 0x2d9   : > { %3162 = vst [vmem:[%s4490_s17 + $0x318] sm:$0xff] %v2948_v18 }
 0x2da   : > { %v2407_v21 = vpop.f32.mrf.mxu0  ;;  %v2952_v22 = vpop.f32.mrf.mxu1 }
 0x2db   : > { %v2953_v23 = vadd.f32 %v2952_v22, %v2407_v21 }
 0x2dc   : > { %v2409_v24 = vpop.f32.mrf.mxu0  ;;  %v2954_v25 = vpop.f32.mrf.mxu1 }
 0x2dd   : > { %3163 = vst [vmem:[%s4490_s17 + $0x320] sm:$0xff] %v2953_v23 }
 0x2de   : > { %v2410_v26 = vpop.f32.mrf.mxu0  ;;  %v2955_v27 = vpop.f32.mrf.mxu1 }
 0x2df   : > { %v2956_v28 = vadd.f32 %v2955_v27, %v2410_v26 }
 0x2e0   : > { %v2412_v29 = vpop.f32.mrf.mxu0  ;;  %v2957_v30 = vpop.f32.mrf.mxu1 }
 0x2e1   : > { %3164 = vst [vmem:[%s4490_s17 + $0x328] sm:$0xff] %v2956_v28 }
 0x2e2   : > { %v2415_v31 = vpop.f32.mrf.mxu0  ;;  %v2960_v32 = vpop.f32.mrf.mxu1 }
 0x2e3   : > { %v2961_v33 = vadd.f32 %v2960_v32, %v2415_v31 }
 0x2e4   : > { %v2417_v34 = vpop.f32.mrf.mxu0  ;;  %v2962_v35 = vpop.f32.mrf.mxu1 }
 0x2e5   : > { %3165 = vst [vmem:[%s4490_s17 + $0x330] sm:$0xff] %v2961_v33 }
 0x2e6   : > { %v2418_v36 = vpop.f32.mrf.mxu0  ;;  %v2963_v37 = vpop.f32.mrf.mxu1 }
 0x2e7   : > { %v2964_v38 = vadd.f32 %v2963_v37, %v2418_v36 }
 0x2e8   : > { %v2420_v39 = vpop.f32.mrf.mxu0  ;;  %v2965_v40 = vpop.f32.mrf.mxu1 }
 0x2e9   : > { %3166 = vst [vmem:[%s4490_s17 + $0x338] sm:$0xff] %v2964_v38 }
 0x2ea   : > { %v2423_v41 = vpop.f32.mrf.mxu0  ;;  %v2968_v42 = vpop.f32.mrf.mxu1 }
 0x2eb   : > { %v2969_v43 = vadd.f32 %v2968_v42, %v2423_v41 }
 0x2ec   : > { %v2425_v44 = vpop.f32.mrf.mxu0  ;;  %v2970_v45 = vpop.f32.mrf.mxu1 }
 0x2ed   : > { %3167 = vst [vmem:[%s4490_s17 + $0x340] sm:$0xff] %v2969_v43 }
 0x2ee   : > { %v2426_v46 = vpop.f32.mrf.mxu0  ;;  %v2971_v47 = vpop.f32.mrf.mxu1 }
 0x2ef   : > { %v2972_v48 = vadd.f32 %v2971_v47, %v2426_v46 }
 0x2f0   : > { %v2428_v49 = vpop.f32.mrf.mxu0  ;;  %v2973_v50 = vpop.f32.mrf.mxu1 }
 0x2f1   : > { %3168 = vst [vmem:[%s4490_s17 + $0x348] sm:$0xff] %v2972_v48 }
 0x2f2   : > { %v2431_v51 = vpop.f32.mrf.mxu0  ;;  %v2976_v52 = vpop.f32.mrf.mxu1 }
 0x2f3   : > { %v2977_v53 = vadd.f32 %v2976_v52, %v2431_v51 }
 0x2f4   : > { %v2433_v54 = vpop.f32.mrf.mxu0  ;;  %v2978_v55 = vpop.f32.mrf.mxu1 }
 0x2f5   : > { %3169 = vst [vmem:[%s4490_s17 + $0x350] sm:$0xff] %v2977_v53 }
 0x2f6   : > { %v2434_v56 = vpop.f32.mrf.mxu0  ;;  %v2979_v57 = vpop.f32.mrf.mxu1 }
 0x2f7   : > { %v2980_v58 = vadd.f32 %v2979_v57, %v2434_v56 }
 0x2f8   : > { %v2436_v59 = vpop.f32.mrf.mxu0  ;;  %v2981_v60 = vpop.f32.mrf.mxu1 }
 0x2f9   : > { %3170 = vst [vmem:[%s4490_s17 + $0x358] sm:$0xff] %v2980_v58 }
 0x2fa   : > { %v2439_v61 = vpop.f32.mrf.mxu0  ;;  %v2984_v62 = vpop.f32.mrf.mxu1 }
 0x2fb   : > { %v2985_v63 = vadd.f32 %v2984_v62, %v2439_v61 }
 0x2fc   : > { %v2441_v0 = vpop.f32.mrf.mxu0  ;;  %v2986_v1 = vpop.f32.mrf.mxu1 }
 0x2fd   : > { %3171 = vst [vmem:[%s4490_s17 + $0x360] sm:$0xff] %v2985_v63 }
 0x2fe   : > { %v2442_v2 = vpop.f32.mrf.mxu0  ;;  %v2987_v3 = vpop.f32.mrf.mxu1 }
 0x2ff   : > { %v2988_v4 = vadd.f32 %v2987_v3, %v2442_v2 }
 0x300   : > { %v2444_v5 = vpop.f32.mrf.mxu0  ;;  %v2989_v6 = vpop.f32.mrf.mxu1 }
 0x301   : > { %3172 = vst [vmem:[%s4490_s17 + $0x368] sm:$0xff] %v2988_v4 }
 0x302   : > { %v2447_v7 = vpop.f32.mrf.mxu0  ;;  %v2992_v8 = vpop.f32.mrf.mxu1 }
 0x303   : > { %v2993_v9 = vadd.f32 %v2992_v8, %v2447_v7 }
 0x304   : > { %v2449_v10 = vpop.f32.mrf.mxu0  ;;  %v2994_v11 = vpop.f32.mrf.mxu1 }
 0x305   : > { %3173 = vst [vmem:[%s4490_s17 + $0x370] sm:$0xff] %v2993_v9 }
 0x306   : > { %v2450_v12 = vpop.f32.mrf.mxu0  ;;  %v2995_v13 = vpop.f32.mrf.mxu1 }
 0x307   : > { %v2996_v14 = vadd.f32 %v2995_v13, %v2450_v12 }
 0x308   : > { %v2452_v15 = vpop.f32.mrf.mxu0  ;;  %v2997_v16 = vpop.f32.mrf.mxu1 }
 0x309   : > { %3174 = vst [vmem:[%s4490_s17 + $0x378] sm:$0xff] %v2996_v14 }
 0x30a   : > { %v2455_v17 = vpop.f32.mrf.mxu0  ;;  %v3000_v18 = vpop.f32.mrf.mxu1 }
 0x30b   : > { %v3001_v19 = vadd.f32 %v3000_v18, %v2455_v17 }
 0x30c   : > { %v2457_v20 = vpop.f32.mrf.mxu0  ;;  %v3002_v21 = vpop.f32.mrf.mxu1 }
 0x30d   : > { %3175 = vst [vmem:[%s4490_s17 + $0x380] sm:$0xff] %v3001_v19 }
 0x30e   : > { %v2458_v22 = vpop.f32.mrf.mxu0  ;;  %v3003_v23 = vpop.f32.mrf.mxu1 }
 0x30f   : > { %v3004_v24 = vadd.f32 %v3003_v23, %v2458_v22 }
 0x310   : > { %v2460_v25 = vpop.f32.mrf.mxu0  ;;  %v3005_v26 = vpop.f32.mrf.mxu1 }
 0x311   : > { %3176 = vst [vmem:[%s4490_s17 + $0x388] sm:$0xff] %v3004_v24 }
 0x312   : > { %v2463_v27 = vpop.f32.mrf.mxu0  ;;  %v3008_v28 = vpop.f32.mrf.mxu1 }
 0x313   : > { %v3009_v29 = vadd.f32 %v3008_v28, %v2463_v27 }
 0x314   : > { %v2465_v30 = vpop.f32.mrf.mxu0  ;;  %v3010_v31 = vpop.f32.mrf.mxu1 }
 0x315   : > { %3177 = vst [vmem:[%s4490_s17 + $0x390] sm:$0xff] %v3009_v29 }
 0x316   : > { %v2466_v32 = vpop.f32.mrf.mxu0  ;;  %v3011_v33 = vpop.f32.mrf.mxu1 }
 0x317   : > { %v3012_v34 = vadd.f32 %v3011_v33, %v2466_v32 }
 0x318   : > { %v2468_v35 = vpop.f32.mrf.mxu0  ;;  %v3013_v36 = vpop.f32.mrf.mxu1 }
 0x319   : > { %3178 = vst [vmem:[%s4490_s17 + $0x398] sm:$0xff] %v3012_v34 }
 0x31a   : > { %v2471_v37 = vpop.f32.mrf.mxu0  ;;  %v3016_v38 = vpop.f32.mrf.mxu1 }
 0x31b   : > { %v3017_v39 = vadd.f32 %v3016_v38, %v2471_v37 }
 0x31c   : > { %v2473_v40 = vpop.f32.mrf.mxu0  ;;  %v3018_v41 = vpop.f32.mrf.mxu1 }
 0x31d   : > { %3179 = vst [vmem:[%s4490_s17 + $0x3a0] sm:$0xff] %v3017_v39 }
 0x31e   : > { %v2474_v42 = vpop.f32.mrf.mxu0  ;;  %v3019_v43 = vpop.f32.mrf.mxu1 }
 0x31f   : > { %v3020_v44 = vadd.f32 %v3019_v43, %v2474_v42 }
 0x320   : > { %v2476_v45 = vpop.f32.mrf.mxu0  ;;  %v3021_v46 = vpop.f32.mrf.mxu1 }
 0x321   : > { %3180 = vst [vmem:[%s4490_s17 + $0x3a8] sm:$0xff] %v3020_v44 }
 0x322   : > { %v2479_v47 = vpop.f32.mrf.mxu0  ;;  %v3024_v48 = vpop.f32.mrf.mxu1 }
 0x323   : > { %v3025_v49 = vadd.f32 %v3024_v48, %v2479_v47 }
 0x324   : > { %v2481_v50 = vpop.f32.mrf.mxu0  ;;  %v3026_v51 = vpop.f32.mrf.mxu1 }
 0x325   : > { %3181 = vst [vmem:[%s4490_s17 + $0x3b0] sm:$0xff] %v3025_v49 }
 0x326   : > { %v2482_v52 = vpop.f32.mrf.mxu0  ;;  %v3027_v53 = vpop.f32.mrf.mxu1 }
 0x327   : > { %v3028_v54 = vadd.f32 %v3027_v53, %v2482_v52 }
 0x328   : > { %v2484_v55 = vpop.f32.mrf.mxu0  ;;  %v3029_v56 = vpop.f32.mrf.mxu1 }
 0x329   : > { %3182 = vst [vmem:[%s4490_s17 + $0x3b8] sm:$0xff] %v3028_v54 }
 0x32a   : > { %v2487_v57 = vpop.f32.mrf.mxu0  ;;  %v3032_v58 = vpop.f32.mrf.mxu1 }
 0x32b   : > { %v3033_v59 = vadd.f32 %v3032_v58, %v2487_v57 }
 0x32c   : > { %v2489_v60 = vpop.f32.mrf.mxu0  ;;  %v3034_v61 = vpop.f32.mrf.mxu1 }
 0x32d   : > { %3183 = vst [vmem:[%s4490_s17 + $0x3c0] sm:$0xff] %v3033_v59 }
 0x32e   : > { %v2490_v62 = vpop.f32.mrf.mxu0  ;;  %v3035_v63 = vpop.f32.mrf.mxu1 }
 0x32f   : > { %v3036_v0 = vadd.f32 %v3035_v63, %v2490_v62 }
 0x330   : > { %v2492_v1 = vpop.f32.mrf.mxu0  ;;  %v3037_v2 = vpop.f32.mrf.mxu1 }
 0x331   : > { %3184 = vst [vmem:[%s4490_s17 + $0x3c8] sm:$0xff] %v3036_v0 }
 0x332   : > { %v2495_v3 = vpop.f32.mrf.mxu0  ;;  %v3040_v4 = vpop.f32.mrf.mxu1 }
 0x333   : > { %v3041_v5 = vadd.f32 %v3040_v4, %v2495_v3 }
 0x334   : > { %v2497_v6 = vpop.f32.mrf.mxu0  ;;  %v3042_v7 = vpop.f32.mrf.mxu1 }
 0x335   : > { %3185 = vst [vmem:[%s4490_s17 + $0x3d0] sm:$0xff] %v3041_v5 }
 0x336   : > { %v2498_v8 = vpop.f32.mrf.mxu0  ;;  %v3043_v9 = vpop.f32.mrf.mxu1 }
 0x337   : > { %v3044_v10 = vadd.f32 %v3043_v9, %v2498_v8 }
 0x338   : > { %v2500_v11 = vpop.f32.mrf.mxu0  ;;  %v3045_v12 = vpop.f32.mrf.mxu1 }
 0x339   : > { %3186 = vst [vmem:[%s4490_s17 + $0x3d8] sm:$0xff] %v3044_v10 }
 0x33a   : > { %v2503_v13 = vpop.f32.mrf.mxu0  ;;  %v3048_v14 = vpop.f32.mrf.mxu1 }
 0x33b   : > { %v3049_v15 = vadd.f32 %v3048_v14, %v2503_v13 }
 0x33c   : > { %v2505_v16 = vpop.f32.mrf.mxu0  ;;  %v3050_v17 = vpop.f32.mrf.mxu1 }
 0x33d   : > { %3187 = vst [vmem:[%s4490_s17 + $0x3e0] sm:$0xff] %v3049_v15 }
 0x33e   : > { %v2506_v18 = vpop.f32.mrf.mxu0  ;;  %v3051_v19 = vpop.f32.mrf.mxu1 }
 0x33f   : > { %v3052_v20 = vadd.f32 %v3051_v19, %v2506_v18 }
 0x340   : > { %v2508_v21 = vpop.f32.mrf.mxu0  ;;  %v3053_v22 = vpop.f32.mrf.mxu1 }
 0x341   : > { %3188 = vst [vmem:[%s4490_s17 + $0x3e8] sm:$0xff] %v3052_v20 }
 0x342   : > { %v2511_v23 = vpop.f32.mrf.mxu0  ;;  %v3056_v24 = vpop.f32.mrf.mxu1 }
 0x343   : > { %v3057_v25 = vadd.f32 %v3056_v24, %v2511_v23 }
 0x344   : > { %v2513_v26 = vpop.f32.mrf.mxu0  ;;  %v3058_v27 = vpop.f32.mrf.mxu1 }
 0x345   : > { %3189 = vst [vmem:[%s4490_s17 + $0x3f0] sm:$0xff] %v3057_v25 }
 0x346   : > { %v2514_v28 = vpop.f32.mrf.mxu0  ;;  %v3059_v29 = vpop.f32.mrf.mxu1 }
 0x347   : > { %v3060_v30 = vadd.f32 %v3059_v29, %v2514_v28 }
 0x348   : > { %v2516_v31 = vpop.f32.mrf.mxu0  ;;  %v3061_v32 = vpop.f32.mrf.mxu1 }
 0x349   : > { %3190 = vst [vmem:[%s4490_s17 + $0x3f8] sm:$0xff] %v3060_v30 }
 0x34a   : > { %4143 = shalt.err (!%p4140_p0)
}
 0x34b   : > { %s4144_s4 = scalar_lea.hbm %s4778_s25, 16384  ;;  %s4148_s7 = scalar_lea.hbm %s4826_s2, 32768 }
 0x34c   : > { %p4145_p5 = scmp.ne.s32.totalorder %s4778_s25, %s4144_s4  ;;  %p4149_p4 = scmp.lt.s32.totalorder %s4778_s25, %s4826_s2 }
 0x34d   : > { %p4150_p6 = scmp.lt.s32.totalorder %s4148_s7, %s4144_s4 }
 0x34e   : > { %p4146_p9 = pnand %p4145_p5, %p4842_p11 }
 0x34f   : > { %p4151_p8 = por %p4150_p6, %p4149_p4 }
 0x350   : > { %p4147_p1 = pneg %p4146_p9 }
 0x352   : > { %p4152_p3 = pnand %p4151_p8, %p4147_p1 }
 0x354   : > { %4155 = shalt.err (!%p4152_p3)
}
 0x355   : > { %s4208_s24 = smov 128   ;;  %s4209_s15 = smov 8  }
 0x356   : > { %3602 = dma.vmem_to_hbm [thread:$0]  (%p4842_p11), %s4780_s18, 16384, %s4778_s25, %s3192_s13, %s4208_s24, %s4208_s24, %s4209_s15  }
 0x357 PF: > { %s3220_s17 = sand.u32 1, %s4186_s9   ;;  %p4843_p7 = scmp.ne.s32.totalorder %s4832_s16, 0 }
 0x358   : > { %p4844_p12 = scmp.ge.s32.totalorder %s4198_s12, 2  ;;  %s3221_s8 = scalar_lea.sflag [#allocation4], %s3220_s17 }
 0x35a   : > { %p3613_p10 = pnand %p4844_p12, %p4843_p7 }
 0x35c   : > { %p3614_p2 = pneg %p3613_p10 }
 0x35e   : > { %4181 = dma.done.wait (%p3614_p2), %s3221_s8, 16384  }
 0x35f   : > { %4183 = vsyncadd (%p3614_p2), %s3221_s8, 4294950912  ;;  %p16_p13 = scmp.ge.s32.totalorder %s4279_s21, 4   ;;  %s4845_s9 = smov %s4190_s10 }
 0x360   : > { %s4846_s10 = smov %s4194_s11  ;;  %s4847_s11 = smov %s4296_s29 }
 0x361   : > { %s4848_s12 = smov %s4279_s21  ;;  %18 = sbr.rel (!%p16_p13) target bundleno = 6 (0x6), region = 77 }
 0x366   :  { %3226 = vsyncpa [#allocation3], 1 }
 0x367   :  { %3228 = vsyncpa [#allocation3 + $0x1], 1 }
 0x368   :  { %3229 = vsyncpa [#allocation6], 1 }
 0x369   :  { %3230 = vsyncpa [#allocation4], 1 }
 0x36a   :  { %3232 = vsyncpa [#allocation4 + $0x1], 1 }

</bundles_post_ra>
